<compile_context>
chip_gen: v7x
topology: tpu7x:2x2x1
jax: 0.10.0
libtpu: 0.0.40
codegen_flags: <defaults>
</compile_context>

<pallas_src>
from functools import partial

import numpy as np
import jax
import jax.numpy as jnp
from jax.experimental import pallas as pl
from jax.experimental.pallas import tpu as pltpu

_HI = jax.lax.Precision.HIGHEST


# -----------------------------------------------------------------------------
# Glue (plain JAX): spectral pooling (FFT) + bilinear lerp coefficients
# -----------------------------------------------------------------------------
def spectral_pool_2d(x, scale_factor):
    # TODO(synk): SpectralPool2d is not defined in the provided source; this is the
    # standard FFT center-crop spectral pooling (fft2 -> fftshift -> crop ->
    # ifftshift -> ifft2 -> real).  FFT has no Pallas equivalent, so it stays in JAX.
    B, C, H, W = x.shape
    Hn = int(H * scale_factor[0])
    Wn = int(W * scale_factor[1])
    Xf = jnp.fft.fftshift(jnp.fft.fft2(x, axes=(-2, -1)), axes=(-2, -1))
    h0 = (H - Hn) // 2
    w0 = (W - Wn) // 2
    Xc = Xf[..., h0:h0 + Hn, w0:w0 + Wn]
    y = jnp.fft.ifft2(jnp.fft.ifftshift(Xc, axes=(-2, -1)), axes=(-2, -1)).real
    return y.astype(jnp.float32)


def bilinear_lerp_coeffs(h_out, h_in):
    """2-tap row coefficients matching F.interpolate(mode='bilinear',
    align_corners=False) along H (W is unchanged).  Static numpy."""
    if h_out == h_in:
        idx = np.arange(h_out)
        return idx, idx, np.zeros(h_out, np.float32)
    scale = h_in / h_out
    p = np.arange(h_out, dtype=np.float64)
    src = np.maximum((p + 0.5) * scale - 0.5, 0.0)
    lo = np.floor(src).astype(np.int64)
    lam = (src - lo).astype(np.float32)
    return np.clip(lo, 0, h_in - 1), np.clip(lo + 1, 0, h_in - 1), lam


# -----------------------------------------------------------------------------
# Pallas kernel.  Layout: rows = pooled H, lanes = b2*C*W + c*W + w (L lanes).
# All heavy lifting is MXU matmuls against small precomposed block matrices;
# the VPU only does bias adds, relu, the gate multiply and the final add.
# -----------------------------------------------------------------------------
def _pool_layer_kernel(x_ref, id_ref, m0_ref, m1_ref, m2_ref, dsh_ref, ush_ref,
                       cb_ref, s_ref, a1_ref, a1b_ref, a2_ref, a2b_ref, r_ref,
                       out_ref):
    x = x_ref[0]                                    # (Hp, L)

    # depthwise 3x3 (zero pad) + pointwise 1x1, composed into three per-H-offset
    # (L, L) lane-mix matrices (channel mix + W shift + W zero-pad folded in).
    t0 = jnp.dot(x, m0_ref[...], precision=_HI, preferred_element_type=jnp.float32)
    t1 = jnp.dot(x, m1_ref[...], precision=_HI, preferred_element_type=jnp.float32)
    t2 = jnp.dot(x, m2_ref[...], precision=_HI, preferred_element_type=jnp.float32)

    # H shift (+ H zero padding) via exact 0/1 (Hp, Hp) shift matrices.
    pw = (t1
          + jnp.dot(dsh_ref[...], t0, precision=_HI,
                    preferred_element_type=jnp.float32)
          + jnp.dot(ush_ref[...], t2, precision=_HI,
                    preferred_element_type=jnp.float32)
          + cb_ref[...])                            # composed dw/pw bias lanes

    # SpectralPoolingAttention: mean over W -> 1x1 -> relu -> 1x1 -> sigmoid gate.
    # (gate expansion over W already folded into the second conv's matrix.)
    ym = jnp.dot(pw, s_ref[...],                    # exact 1/W matrix: default prec
                 preferred_element_type=jnp.float32)            # (Hp, nb*C)
    y1 = jnp.maximum(
        jnp.dot(ym, a1_ref[...], precision=_HI,
                preferred_element_type=jnp.float32) + a1b_ref[...], 0.0)
    zg = jnp.dot(y1, a2_ref[...], precision=_HI,
                 preferred_element_type=jnp.float32) + a2b_ref[...]   # (Hp, L)
    att = pw * jax.nn.sigmoid(zg)

    # residual: bilinear H-resize of the raw identity slab as ONE (Hp, H) matmul.
    resid = jnp.dot(r_ref[...], id_ref[0], precision=_HI,
                    preferred_element_type=jnp.float32)

    # single lane-dense store
    out_ref[0] = (att + resid).astype(out_ref.dtype)


# -----------------------------------------------------------------------------
# Wrapper: lane packing + precomposed weight matrices
# -----------------------------------------------------------------------------
@partial(jax.jit, static_argnames=("factor",))
def pooling_layer_forward(x, params, factor=0.75):
    B, C, H, W = x.shape
    x = x.astype(jnp.float32)
    CW = C * W

    # Fold batches into lanes so the lane dim is a multiple of 128 when possible.
    nb = max(1, min(B, 128 // CW)) if CW < 128 else 1
    while B % nb:
        nb -= 1
    G = B // nb
    L = nb * CW

    # spectral pooling (FFT crop) in plain JAX
    xp = spectral_pool_2d(x, (factor, 1.0))          # (B, C, Hp, W)
    Hp = xp.shape[2]
    mid = params['a1_b'].shape[0]

    # lane-dense packing: (B, C, Hh, W) -> (G, Hh, nb*C*W)
    def pack(t):
        Hh = t.shape[2]
        t = jnp.transpose(t, (0, 2, 1, 3)).reshape(B, Hh, CW)
        return t.reshape(G, nb, Hh, CW).transpose(0, 2, 1, 3).reshape(G, Hh, L)

    xg = pack(xp)                                    # pooled activation (no jnp.pad)
    idg = pack(x)                                    # raw identity, shipped once

    eye_nb = jnp.eye(nb, dtype=jnp.float32)
    dwk = params['dw_w'][:, 0].astype(jnp.float32)           # (C, 3, 3)
    pw_w = params['pw_w'][:, :, 0, 0].astype(jnp.float32)    # (C_out, C_in)

    # W-shift matrices with zero padding folded in:
    # SW[dj][w_in, w_out] = 1  iff  w_in == w_out + dj - 1 (both in range)
    SW = np.stack([np.eye(W, k=1), np.eye(W), np.eye(W, k=-1)]).astype(np.float32)

    def lane_mix(di):
        # m[(c_in*W + w_in), (c_out*W + w_out)] = pw_w[c_out, c_in] * dwk[c_in, di, dj]
        m = jnp.einsum('oc,cj,jvw->cvow', pw_w, dwk[:, di, :], SW).reshape(CW, CW)
        return jnp.kron(eye_nb, m)                   # block-diag over packed batches

    m0, m1, m2 = lane_mix(0), lane_mix(1), lane_mix(2)

    # H shift matrices (exact 0/1), H zero padding folded in (row 0 / Hp-1 get 0)
    dsh = jnp.asarray(np.eye(Hp, k=-1), jnp.float32)  # pw[h] += t0[h-1]
    ush = jnp.asarray(np.eye(Hp, k=1), jnp.float32)   # pw[h] += t2[h+1]

    # composed depthwise/pointwise bias as a lane vector
    cb = jnp.tile(jnp.repeat(pw_w @ params['dw_b'] + params['pw_b'], W),
                  nb).reshape(1, L)

    # attention matrices (batch-block-diagonal)
    S = jnp.kron(eye_nb, jnp.kron(jnp.eye(C, dtype=jnp.float32),
                                  jnp.ones((W, 1), jnp.float32)) / W)  # (L, nb*C)
    a1 = jnp.kron(eye_nb, params['a1_w'][:, :, 0, 0].T)                # (nb*C, nb*mid)
    a1b = jnp.tile(params['a1_b'], nb).reshape(1, nb * mid)
    # second conv with the gate expansion over W folded in
    a2 = jnp.kron(eye_nb, jnp.repeat(params['a2_w'][:, :, 0, 0].T, W, axis=1))
    a2b = jnp.tile(jnp.repeat(params['a2_b'], W), nb).reshape(1, L)

    # residual bilinear H-resize matrix
    lo, hi, lam = bilinear_lerp_coeffs(Hp, H)
    Rnp = np.zeros((Hp, H), np.float32)
    Rnp[np.arange(Hp), lo] += (1.0 - lam)
    Rnp[np.arange(Hp), hi] += lam
    R = jnp.asarray(Rnp)

    g3 = lambda g: (g, 0, 0)
    c2 = lambda g: (0, 0)                             # grid-invariant: fetched once

    out = pl.pallas_call(
        _pool_layer_kernel,
        out_shape=jax.ShapeDtypeStruct((G, Hp, L), jnp.float32),
        grid=(G,),
        in_specs=[
            pl.BlockSpec((1, Hp, L), g3),             # pooled x, lane-packed
            pl.BlockSpec((1, H, L), g3),              # raw identity, lane-packed
            pl.BlockSpec((L, L), c2),                 # lane-mix matrix, H offset -1
            pl.BlockSpec((L, L), c2),                 # lane-mix matrix, H offset  0
            pl.BlockSpec((L, L), c2),                 # lane-mix matrix, H offset +1
            pl.BlockSpec((Hp, Hp), c2),               # down-shift (0/1)
            pl.BlockSpec((Hp, Hp), c2),               # up-shift (0/1)
            pl.BlockSpec((1, L), c2),                 # composed conv bias lanes
            pl.BlockSpec((L, nb * C), c2),            # mean-over-W matrix
            pl.BlockSpec((nb * C, nb * mid), c2),     # attention conv1 weight^T
            pl.BlockSpec((1, nb * mid), c2),          # attention conv1 bias
            pl.BlockSpec((nb * mid, L), c2),          # attention conv2 (E folded in)
            pl.BlockSpec((1, L), c2),                 # attention conv2 bias lanes
            pl.BlockSpec((Hp, H), c2),                # residual H-resize matrix
        ],
        out_specs=pl.BlockSpec((1, Hp, L), g3),
        compiler_params=pltpu.CompilerParams(
            dimension_semantics=("parallel",),
            vmem_limit_bytes=32 * 1024 * 1024),
    )(xg, idg, m0, m1, m2, dsh, ush, cb, S, a1, a1b, a2, a2b, R)

    # unpack lanes back to NCHW
    return out.reshape(G, Hp, nb, C, W).transpose(0, 2, 3, 1, 4).reshape(B, C, Hp, W)


# -----------------------------------------------------------------------------
# Pure-JAX reference (same math, no Pallas) for validation
# -----------------------------------------------------------------------------
def reference_forward(x, params, factor=0.75):
    x = x.astype(jnp.float32)
    identity = x
    xp = spectral_pool_2d(x, (factor, 1.0))
    B, C, Hp, W = xp.shape
    xpad = jnp.pad(xp, ((0, 0), (0, 0), (1, 1), (1, 1)))
    wk = params['dw_w'][:, 0]                              # (C, 3, 3)
    dw = jnp.zeros_like(xp)
    for di in range(3):
        for dj in range(3):
            dw = dw + xpad[:, :, di:di + Hp, dj:dj + W] * wk[None, :, di, dj, None, None]
    dw = dw + params['dw_b'][None, :, None, None]
    pw = jnp.einsum('oc,bchw->bohw', params['pw_w'][:, :, 0, 0], dw,
                    precision=_HI) + params['pw_b'][None, :, None, None]
    ym = jnp.mean(pw, axis=-1)
    y1 = jnp.einsum('mc,bch->bmh', params['a1_w'][:, :, 0, 0], ym,
                    precision=_HI) + params['a1_b'][None, :, None]
    y1 = jnp.maximum(y1, 0.0)
    y2 = jnp.einsum('cm,bmh->bch', params['a2_w'][:, :, 0, 0], y1,
                    precision=_HI) + params['a2_b'][None, :, None]
    att = pw * jax.nn.sigmoid(y2)[..., None]
    H = x.shape[2]
    lo, hi, lam = bilinear_lerp_coeffs(Hp, H)
    lamj = jnp.asarray(lam, jnp.float32)[None, None, :, None]
    identity = (1.0 - lamj) * identity[:, :, lo, :] + lamj * identity[:, :, hi, :]
    return att + identity


def init_params(key, in_channels, reduction=16):
    C = in_channels
    mid = max(C // reduction, 1)
    ks = jax.random.split(key, 8)

    def rnd(k, shape, scale):
        return (scale * jax.random.normal(k, shape)).astype(jnp.float32)

    return {
        'dw_w': rnd(ks[0], (C, 1, 3, 3), 0.25),   # depthwise conv weight
        'dw_b': rnd(ks[1], (C,), 0.10),
        'pw_w': rnd(ks[2], (C, C, 1, 1), 0.25),   # pointwise conv weight
        'pw_b': rnd(ks[3], (C,), 0.10),
        'a1_w': rnd(ks[4], (mid, C, 1, 1), 0.25), # attention conv1
        'a1_b': rnd(ks[5], (mid,), 0.10),
        'a2_w': rnd(ks[6], (C, mid, 1, 1), 0.25), # attention conv2
        'a2_b': rnd(ks[7], (C,), 0.10),
    }


if __name__ == "__main__":
    B, C, H, W = 2, 4, 16, 16
    key = jax.random.PRNGKey(0)
    kx, kp = jax.random.split(key)
    x = jax.random.normal(kx, (B, C, H, W), jnp.float32)
    params = init_params(kp, C, reduction=16)

    out = jax.block_until_ready(pooling_layer_forward(x, params, factor=0.75))
    ref = jax.block_until_ready(reference_forward(x, params, factor=0.75))

    assert out.shape == (B, C, int(H * 0.75), W), out.shape
    assert bool(jnp.allclose(out, ref, rtol=1e-3, atol=1e-3)), \
        float(jnp.max(jnp.abs(out - ref)))
    print("KERNEL_OK")
</pallas_src>

<mosaic_0001>
module attributes {stable_mosaic.version = 11 : i64} {
  func.func @_pool_layer_kernel(%arg0: i32, %arg1: memref<1x12x128xf32, #tpu.memory_space<vmem>>, %arg2: memref<1x16x128xf32, #tpu.memory_space<vmem>>, %arg3: memref<128x128xf32, #tpu.memory_space<vmem>>, %arg4: memref<128x128xf32, #tpu.memory_space<vmem>>, %arg5: memref<128x128xf32, #tpu.memory_space<vmem>>, %arg6: memref<12x12xf32, #tpu.memory_space<vmem>>, %arg7: memref<12x12xf32, #tpu.memory_space<vmem>>, %arg8: memref<1x128xf32, #tpu.memory_space<vmem>>, %arg9: memref<128x8xf32, #tpu.memory_space<vmem>>, %arg10: memref<8x2xf32, #tpu.memory_space<vmem>>, %arg11: memref<1x2xf32, #tpu.memory_space<vmem>>, %arg12: memref<2x128xf32, #tpu.memory_space<vmem>>, %arg13: memref<1x128xf32, #tpu.memory_space<vmem>>, %arg14: memref<12x16xf32, #tpu.memory_space<vmem>>, %arg15: memref<1x12x128xf32, #tpu.memory_space<vmem>>) attributes {dimension_semantics = [#tpu.dimension_semantics<parallel>], iteration_bounds = array<i64: 1>, scalar_prefetch = 0 : i64, scratch_operands = 0 : i64, tpu.core_type = #tpu.core_type<tc>, window_params = [{transform_indices = @transform_0, window_bounds = array<i64: 1, 12, 128>}, {transform_indices = @transform_1, window_bounds = array<i64: 1, 16, 128>}, {pipeline_mode = #tpu.pipeline_mode<synchronous>, transform_indices = @transform_2, window_bounds = array<i64: 128, 128>}, {pipeline_mode = #tpu.pipeline_mode<synchronous>, transform_indices = @transform_3, window_bounds = array<i64: 128, 128>}, {pipeline_mode = #tpu.pipeline_mode<synchronous>, transform_indices = @transform_4, window_bounds = array<i64: 128, 128>}, {pipeline_mode = #tpu.pipeline_mode<synchronous>, transform_indices = @transform_5, window_bounds = array<i64: 12, 12>}, {pipeline_mode = #tpu.pipeline_mode<synchronous>, transform_indices = @transform_6, window_bounds = array<i64: 12, 12>}, {pipeline_mode = #tpu.pipeline_mode<synchronous>, transform_indices = @transform_7, window_bounds = array<i64: 1, 128>}, {pipeline_mode = #tpu.pipeline_mode<synchronous>, transform_indices = @transform_8, window_bounds = array<i64: 128, 8>}, {pipeline_mode = #tpu.pipeline_mode<synchronous>, transform_indices = @transform_9, window_bounds = array<i64: 8, 2>}, {pipeline_mode = #tpu.pipeline_mode<synchronous>, transform_indices = @transform_10, window_bounds = array<i64: 1, 2>}, {pipeline_mode = #tpu.pipeline_mode<synchronous>, transform_indices = @transform_11, window_bounds = array<i64: 2, 128>}, {pipeline_mode = #tpu.pipeline_mode<synchronous>, transform_indices = @transform_12, window_bounds = array<i64: 1, 128>}, {pipeline_mode = #tpu.pipeline_mode<synchronous>, transform_indices = @transform_13, window_bounds = array<i64: 12, 16>}, {transform_indices = @transform_14, window_bounds = array<i64: 1, 12, 128>}]} {
    %c0 = arith.constant 0 : index
    %c0_0 = arith.constant 0 : index
    %c0_1 = arith.constant 0 : index
    %0 = vector.load %arg1[%c0, %c0_0, %c0_1] : memref<1x12x128xf32, #tpu.memory_space<vmem>>, vector<1x12x128xf32>
    %1 = vector.shape_cast %0 : vector<1x12x128xf32> to vector<12x128xf32>
    %c0_2 = arith.constant 0 : index
    %c0_3 = arith.constant 0 : index
    %2 = vector.load %arg3[%c0_2, %c0_3] : memref<128x128xf32, #tpu.memory_space<vmem>>, vector<128x128xf32>
    %cst = arith.constant dense<0.000000e+00> : vector<12x128xf32>
    %3 = tpu.matmul %1, %2, %cst {dimension_numbers = #tpu.dot_dimension_numbers<[1], [0], [0], [1], [0, 0, 1, 1], [], []>, precision = #tpu.contract_precision<fp32>} : vector<12x128xf32>, vector<128x128xf32>, vector<12x128xf32> -> vector<12x128xf32>
    %c0_4 = arith.constant 0 : index
    %c0_5 = arith.constant 0 : index
    %4 = vector.load %arg4[%c0_4, %c0_5] : memref<128x128xf32, #tpu.memory_space<vmem>>, vector<128x128xf32>
    %cst_6 = arith.constant dense<0.000000e+00> : vector<12x128xf32>
    %5 = tpu.matmul %1, %4, %cst_6 {dimension_numbers = #tpu.dot_dimension_numbers<[1], [0], [0], [1], [0, 0, 1, 1], [], []>, precision = #tpu.contract_precision<fp32>} : vector<12x128xf32>, vector<128x128xf32>, vector<12x128xf32> -> vector<12x128xf32>
    %c0_7 = arith.constant 0 : index
    %c0_8 = arith.constant 0 : index
    %6 = vector.load %arg5[%c0_7, %c0_8] : memref<128x128xf32, #tpu.memory_space<vmem>>, vector<128x128xf32>
    %cst_9 = arith.constant dense<0.000000e+00> : vector<12x128xf32>
    %7 = tpu.matmul %1, %6, %cst_9 {dimension_numbers = #tpu.dot_dimension_numbers<[1], [0], [0], [1], [0, 0, 1, 1], [], []>, precision = #tpu.contract_precision<fp32>} : vector<12x128xf32>, vector<128x128xf32>, vector<12x128xf32> -> vector<12x128xf32>
    %c0_10 = arith.constant 0 : index
    %c0_11 = arith.constant 0 : index
    %8 = vector.load %arg6[%c0_10, %c0_11] : memref<12x12xf32, #tpu.memory_space<vmem>>, vector<12x12xf32>
    %cst_12 = arith.constant dense<0.000000e+00> : vector<12x128xf32>
    %9 = tpu.matmul %8, %3, %cst_12 {dimension_numbers = #tpu.dot_dimension_numbers<[1], [0], [0], [1], [0, 0, 1, 1], [], []>, precision = #tpu.contract_precision<fp32>} : vector<12x12xf32>, vector<12x128xf32>, vector<12x128xf32> -> vector<12x128xf32>
    %10 = arith.addf %5, %9 : vector<12x128xf32>
    %c0_13 = arith.constant 0 : index
    %c0_14 = arith.constant 0 : index
    %11 = vector.load %arg7[%c0_13, %c0_14] : memref<12x12xf32, #tpu.memory_space<vmem>>, vector<12x12xf32>
    %cst_15 = arith.constant dense<0.000000e+00> : vector<12x128xf32>
    %12 = tpu.matmul %11, %7, %cst_15 {dimension_numbers = #tpu.dot_dimension_numbers<[1], [0], [0], [1], [0, 0, 1, 1], [], []>, precision = #tpu.contract_precision<fp32>} : vector<12x12xf32>, vector<12x128xf32>, vector<12x128xf32> -> vector<12x128xf32>
    %13 = arith.addf %10, %12 : vector<12x128xf32>
    %c0_16 = arith.constant 0 : index
    %c0_17 = arith.constant 0 : index
    %14 = vector.load %arg8[%c0_16, %c0_17] : memref<1x128xf32, #tpu.memory_space<vmem>>, vector<1x128xf32>
    %15 = vector.broadcast %14 : vector<1x128xf32> to vector<12x128xf32>
    %16 = arith.addf %13, %15 : vector<12x128xf32>
    %c0_18 = arith.constant 0 : index
    %c0_19 = arith.constant 0 : index
    %17 = vector.load %arg9[%c0_18, %c0_19] : memref<128x8xf32, #tpu.memory_space<vmem>>, vector<128x8xf32>
    %cst_20 = arith.constant dense<0.000000e+00> : vector<12x8xf32>
    %18 = tpu.matmul %16, %17, %cst_20 {dimension_numbers = #tpu.dot_dimension_numbers<[1], [0], [0], [1], [0, 0, 1, 1], [], []>} : vector<12x128xf32>, vector<128x8xf32>, vector<12x8xf32> -> vector<12x8xf32>
    %c0_21 = arith.constant 0 : index
    %c0_22 = arith.constant 0 : index
    %19 = vector.load %arg10[%c0_21, %c0_22] : memref<8x2xf32, #tpu.memory_space<vmem>>, vector<8x2xf32>
    %cst_23 = arith.constant dense<0.000000e+00> : vector<12x2xf32>
    %20 = tpu.matmul %18, %19, %cst_23 {dimension_numbers = #tpu.dot_dimension_numbers<[1], [0], [0], [1], [0, 0, 1, 1], [], []>, precision = #tpu.contract_precision<fp32>} : vector<12x8xf32>, vector<8x2xf32>, vector<12x2xf32> -> vector<12x2xf32>
    %c0_24 = arith.constant 0 : index
    %c0_25 = arith.constant 0 : index
    %21 = vector.load %arg11[%c0_24, %c0_25] : memref<1x2xf32, #tpu.memory_space<vmem>>, vector<1x2xf32>
    %22 = vector.broadcast %21 : vector<1x2xf32> to vector<12x2xf32>
    %23 = arith.addf %20, %22 : vector<12x2xf32>
    %cst_26 = arith.constant 0.000000e+00 : f32
    %24 = vector.broadcast %cst_26 : f32 to vector<12x2xf32>
    %25 = arith.maximumf %23, %24 : vector<12x2xf32>
    %c0_27 = arith.constant 0 : index
    %c0_28 = arith.constant 0 : index
    %26 = vector.load %arg12[%c0_27, %c0_28] : memref<2x128xf32, #tpu.memory_space<vmem>>, vector<2x128xf32>
    %cst_29 = arith.constant dense<0.000000e+00> : vector<12x128xf32>
    %27 = tpu.matmul %25, %26, %cst_29 {dimension_numbers = #tpu.dot_dimension_numbers<[1], [0], [0], [1], [0, 0, 1, 1], [], []>, precision = #tpu.contract_precision<fp32>} : vector<12x2xf32>, vector<2x128xf32>, vector<12x128xf32> -> vector<12x128xf32>
    %c0_30 = arith.constant 0 : index
    %c0_31 = arith.constant 0 : index
    %28 = vector.load %arg13[%c0_30, %c0_31] : memref<1x128xf32, #tpu.memory_space<vmem>>, vector<1x128xf32>
    %29 = vector.broadcast %28 : vector<1x128xf32> to vector<12x128xf32>
    %30 = arith.addf %27, %29 : vector<12x128xf32>
    %31 = arith.negf %30 : vector<12x128xf32>
    %32 = math.exp %31 : vector<12x128xf32>
    %cst_32 = arith.constant 1.000000e+00 : f32
    %33 = vector.broadcast %cst_32 : f32 to vector<12x128xf32>
    %34 = arith.addf %33, %32 : vector<12x128xf32>
    %35 = arith.divf %33, %34 : vector<12x128xf32>
    %36 = arith.mulf %16, %35 : vector<12x128xf32>
    %c0_33 = arith.constant 0 : index
    %c0_34 = arith.constant 0 : index
    %37 = vector.load %arg14[%c0_33, %c0_34] : memref<12x16xf32, #tpu.memory_space<vmem>>, vector<12x16xf32>
    %c0_35 = arith.constant 0 : index
    %c0_36 = arith.constant 0 : index
    %c0_37 = arith.constant 0 : index
    %38 = vector.load %arg2[%c0_35, %c0_36, %c0_37] : memref<1x16x128xf32, #tpu.memory_space<vmem>>, vector<1x16x128xf32>
    %39 = vector.shape_cast %38 : vector<1x16x128xf32> to vector<16x128xf32>
    %cst_38 = arith.constant dense<0.000000e+00> : vector<12x128xf32>
    %40 = tpu.matmul %37, %39, %cst_38 {dimension_numbers = #tpu.dot_dimension_numbers<[1], [0], [0], [1], [0, 0, 1, 1], [], []>, precision = #tpu.contract_precision<fp32>} : vector<12x16xf32>, vector<16x128xf32>, vector<12x128xf32> -> vector<12x128xf32>
    %41 = arith.addf %36, %40 : vector<12x128xf32>
    %c0_39 = arith.constant 0 : index
    %c0_40 = arith.constant 0 : index
    %c0_41 = arith.constant 0 : index
    %42 = vector.load %arg15[%c0_39, %c0_40, %c0_41] : memref<1x12x128xf32, #tpu.memory_space<vmem>>, vector<1x12x128xf32>
    %43 = vector.shape_cast %42 : vector<1x12x128xf32> to vector<12x128xf32>
    %44 = vector.shape_cast %41 : vector<12x128xf32> to vector<1x12x128xf32>
    tpu.vector_store %arg15[%c0_39, %c0_40, %c0_41], %44 {strides = array<i32>} : memref<1x12x128xf32, #tpu.memory_space<vmem>>, vector<1x12x128xf32>,
    return
  }
  func.func @transform_0(%arg0: i32) -> (i32, i32, i32) {
    %c0_i32 = arith.constant 0 : i32
    %c0_i32_0 = arith.constant 0 : i32
    %c0_i32_1 = arith.constant 0 : i32
    return %arg0, %c0_i32, %c0_i32_0 : i32, i32, i32
  }
  func.func @transform_1(%arg0: i32) -> (i32, i32, i32) {
    %c0_i32 = arith.constant 0 : i32
    %c0_i32_0 = arith.constant 0 : i32
    %c0_i32_1 = arith.constant 0 : i32
    return %arg0, %c0_i32, %c0_i32_0 : i32, i32, i32
  }
  func.func @transform_2(%arg0: i32) -> (i32, i32) {
    %c0_i32 = arith.constant 0 : i32
    %c0_i32_0 = arith.constant 0 : i32
    %c0_i32_1 = arith.constant 0 : i32
    return %c0_i32, %c0_i32_0 : i32, i32
  }
  func.func @transform_3(%arg0: i32) -> (i32, i32) {
    %c0_i32 = arith.constant 0 : i32
    %c0_i32_0 = arith.constant 0 : i32
    %c0_i32_1 = arith.constant 0 : i32
    return %c0_i32, %c0_i32_0 : i32, i32
  }
  func.func @transform_4(%arg0: i32) -> (i32, i32) {
    %c0_i32 = arith.constant 0 : i32
    %c0_i32_0 = arith.constant 0 : i32
    %c0_i32_1 = arith.constant 0 : i32
    return %c0_i32, %c0_i32_0 : i32, i32
  }
  func.func @transform_5(%arg0: i32) -> (i32, i32) {
    %c0_i32 = arith.constant 0 : i32
    %c0_i32_0 = arith.constant 0 : i32
    %c0_i32_1 = arith.constant 0 : i32
    return %c0_i32, %c0_i32_0 : i32, i32
  }
  func.func @transform_6(%arg0: i32) -> (i32, i32) {
    %c0_i32 = arith.constant 0 : i32
    %c0_i32_0 = arith.constant 0 : i32
    %c0_i32_1 = arith.constant 0 : i32
    return %c0_i32, %c0_i32_0 : i32, i32
  }
  func.func @transform_7(%arg0: i32) -> (i32, i32) {
    %c0_i32 = arith.constant 0 : i32
    %c0_i32_0 = arith.constant 0 : i32
    %c0_i32_1 = arith.constant 0 : i32
    return %c0_i32, %c0_i32_0 : i32, i32
  }
  func.func @transform_8(%arg0: i32) -> (i32, i32) {
    %c0_i32 = arith.constant 0 : i32
    %c0_i32_0 = arith.constant 0 : i32
    %c0_i32_1 = arith.constant 0 : i32
    return %c0_i32, %c0_i32_0 : i32, i32
  }
  func.func @transform_9(%arg0: i32) -> (i32, i32) {
    %c0_i32 = arith.constant 0 : i32
    %c0_i32_0 = arith.constant 0 : i32
    %c0_i32_1 = arith.constant 0 : i32
    return %c0_i32, %c0_i32_0 : i32, i32
  }
  func.func @transform_10(%arg0: i32) -> (i32, i32) {
    %c0_i32 = arith.constant 0 : i32
    %c0_i32_0 = arith.constant 0 : i32
    %c0_i32_1 = arith.constant 0 : i32
    return %c0_i32, %c0_i32_0 : i32, i32
  }
  func.func @transform_11(%arg0: i32) -> (i32, i32) {
    %c0_i32 = arith.constant 0 : i32
    %c0_i32_0 = arith.constant 0 : i32
    %c0_i32_1 = arith.constant 0 : i32
    return %c0_i32, %c0_i32_0 : i32, i32
  }
  func.func @transform_12(%arg0: i32) -> (i32, i32) {
    %c0_i32 = arith.constant 0 : i32
    %c0_i32_0 = arith.constant 0 : i32
    %c0_i32_1 = arith.constant 0 : i32
    return %c0_i32, %c0_i32_0 : i32, i32
  }
  func.func @transform_13(%arg0: i32) -> (i32, i32) {
    %c0_i32 = arith.constant 0 : i32
    %c0_i32_0 = arith.constant 0 : i32
    %c0_i32_1 = arith.constant 0 : i32
    return %c0_i32, %c0_i32_0 : i32, i32
  }
  func.func @transform_14(%arg0: i32) -> (i32, i32, i32) {
    %c0_i32 = arith.constant 0 : i32
    %c0_i32_0 = arith.constant 0 : i32
    %c0_i32_1 = arith.constant 0 : i32
    return %arg0, %c0_i32, %c0_i32_0 : i32, i32, i32
  }
}

</mosaic_0001>

<bundles_post_ra>
// kernel: mul.18
= control target key start
LH: loop header
LB: loop body
LE: loop exit
PB: predicated region body
PF: predicated region fallthrough
CT: control target
= control target key end

     0   :  { %vm322_vm0 = vcmask 1047556   ;;  %s806_s10 = smov 48   ;;  %vm324_vm1 = vcmask 130048   ;;  %s808_s28 = smov 16   ;;  %vm397_vm2 = vcmask 523648   ;;  %vm484_vm3 = vcmask 392448   ;;  %s1195_s0 = inlined_call_operand.vmem [shape: f32[4,16,4,16], index: 0, kind: input, shape index: {}]   ;;  %s1196_s1 = inlined_call_operand.vmem [shape: f32[64,64], index: 1, kind: output, shape index: {}]  }
   0x1   :  { %v768_v0 = vld [vmem:[%s1195_s0 + $0x1c] sm:$0xf]  ;;  %v769_v1 = vld [vmem:[%s1195_s0 + $0x18] sm:$0xf]  ;;  %v770_v2 = vld [vmem:[%s1195_s0 + $0x14] sm:$0xf] }
   0x2   :  { %288 = vst [vmem:[#allocation0 + $0x38] sm:$0xf] %v768_v0  ;;  %293 = vst [vmem:[#allocation0 + $0x30] sm:$0xf] %v769_v1  ;;  %v771_v3 = vld [vmem:[%s1195_s0 + $0x10] sm:$0xf] }
   0x3   :  { %298 = vst [vmem:[#allocation0 + $0x28] sm:$0xf] %v770_v2  ;;  %v772_v4 = vld [vmem:[%s1195_s0 + $0xc] sm:$0xf]  ;;  %v773_v5 = vld [vmem:[%s1195_s0 + $0x8] sm:$0xf] }
   0x4   :  { %303 = vst [vmem:[#allocation0 + $0x20] sm:$0xf] %v771_v3  ;;  %308 = vst [vmem:[#allocation0 + $0x18] sm:$0xf] %v772_v4  ;;  %v774_v6 = vld [vmem:[%s1195_s0 + $0x4] sm:$0xf] }
   0x5   :  { %313 = vst [vmem:[#allocation0 + $0x10] sm:$0xf] %v773_v5  ;;  %v318_v7 = vld [vmem:[%s1195_s0] sm:$0xf]  ;;  %317 = vst [vmem:[#allocation0 + $0x8] sm:$0xf] %v774_v6 }
   0x6   :  { %319 = vst [vmem:[#allocation0] sm:$0xf] %v318_v7  ;;  %v760_v8 = vld [vmem:[%s1195_s0 + $0x3c] sm:$0xf]  ;;  %v761_v9 = vld [vmem:[%s1195_s0 + $0x38] sm:$0xf] }
   0x7   :  { %v762_v10 = vld [vmem:[%s1195_s0 + $0x34] sm:$0xf]  ;;  %248 = vst [vmem:[#allocation0 + $0x78] sm:$0xf] %v760_v8  ;;  %253 = vst [vmem:[#allocation0 + $0x70] sm:$0xf] %v761_v9 }
   0x8   :  { %258 = vst [vmem:[#allocation0 + $0x68] sm:$0xf] %v762_v10  ;;  %v763_v11 = vld [vmem:[%s1195_s0 + $0x30] sm:$0xf]  ;;  %v764_v12 = vld [vmem:[%s1195_s0 + $0x2c] sm:$0xf] }
   0x9   :  { %v765_v13 = vld [vmem:[%s1195_s0 + $0x28] sm:$0xf]  ;;  %263 = vst [vmem:[#allocation0 + $0x60] sm:$0xf] %v763_v11  ;;  %268 = vst [vmem:[#allocation0 + $0x58] sm:$0xf] %v764_v12 }
   0xa   :  { %273 = vst [vmem:[#allocation0 + $0x50] sm:$0xf] %v765_v13  ;;  %v766_v14 = vld [vmem:[%s1195_s0 + $0x24] sm:$0xf]  ;;  %v767_v15 = vld [vmem:[%s1195_s0 + $0x20] sm:$0xf] }
   0xb   :  { %v736_v16 = vld [vmem:[%s1195_s0 + $0x9c] sm:$0xf]  ;;  %278 = vst [vmem:[#allocation0 + $0x48] sm:$0xf] %v766_v14  ;;  %283 = vst [vmem:[#allocation0 + $0x40] sm:$0xf] %v767_v15 }
   0xc   :  { %128 = vst [vmem:[#allocation0 + $0x138] sm:$0xf] %v736_v16  ;;  %v737_v17 = vld [vmem:[%s1195_s0 + $0x98] sm:$0xf]  ;;  %v738_v18 = vld [vmem:[%s1195_s0 + $0x94] sm:$0xf] }
   0xd   :  { %v739_v19 = vld [vmem:[%s1195_s0 + $0x90] sm:$0xf]  ;;  %133 = vst [vmem:[#allocation0 + $0x130] sm:$0xf] %v737_v17  ;;  %138 = vst [vmem:[#allocation0 + $0x128] sm:$0xf] %v738_v18 }
   0xe   :  { %143 = vst [vmem:[#allocation0 + $0x120] sm:$0xf] %v739_v19  ;;  %v740_v20 = vld [vmem:[%s1195_s0 + $0x8c] sm:$0xf]  ;;  %v741_v21 = vld [vmem:[%s1195_s0 + $0x88] sm:$0xf] }
   0xf   :  { %v742_v22 = vld [vmem:[%s1195_s0 + $0x84] sm:$0xf]  ;;  %148 = vst [vmem:[#allocation0 + $0x118] sm:$0xf] %v740_v20  ;;  %153 = vst [vmem:[#allocation0 + $0x110] sm:$0xf] %v741_v21 }
  0x10   :  { %158 = vst [vmem:[#allocation0 + $0x108] sm:$0xf] %v742_v22  ;;  %v743_v23 = vld [vmem:[%s1195_s0 + $0x80] sm:$0xf]  ;;  %v728_v24 = vld [vmem:[%s1195_s0 + $0xbc] sm:$0xf] }
  0x11   :  { %v729_v25 = vld [vmem:[%s1195_s0 + $0xb8] sm:$0xf]  ;;  %163 = vst [vmem:[#allocation0 + $0x100] sm:$0xf] %v743_v23  ;;  %88 = vst [vmem:[#allocation0 + $0x178] sm:$0xf] %v728_v24 }
  0x12   :  { %v392_v26 = vld [vmem:[#allocation0 + $0x3] ss:$8 sm:$0xf0]   ;;  %93 = vst [vmem:[#allocation0 + $0x170] sm:$0xf] %v729_v25  ;;  %vm571_vm4 = vcmask 261248  }
  0x13   :  { %v730_v27 = vld [vmem:[%s1195_s0 + $0xb4] sm:$0xf]  ;;  %v390_v28 = vld [vmem:[#allocation0 + $0x3] ss:$8 sm:$0xf]  }
  0x14   :  { %98 = vst [vmem:[#allocation0 + $0x168] sm:$0xf] %v730_v27  ;;  %v731_v29 = vld [vmem:[%s1195_s0 + $0xb0] sm:$0xf]  ;;  %v394_v30 = vsel %vm322_vm0, %v392_v26, %v390_v28  ;;  %v732_v31 = vld [vmem:[%s1195_s0 + $0xac] sm:$0xf] }
  0x15   :  { %103 = vst [vmem:[#allocation0 + $0x160] sm:$0xf] %v731_v29  ;;  %v733_v32 = vld [vmem:[%s1195_s0 + $0xa8] sm:$0xf]  ;;  %v734_v33 = vld [vmem:[%s1195_s0 + $0xa4] sm:$0xf]  ;;  %395 = vrot.lane.b32.xlu0 %v394_v30, %s806_s10 }
  0x16   :  { %v413_v34 = vld [vmem:[#allocation0 + $0x43] ss:$8 sm:$0xf0]   ;;  %108 = vst [vmem:[#allocation0 + $0x158] sm:$0xf] %v732_v31 }
  0x17   :  { %113 = vst [vmem:[#allocation0 + $0x150] sm:$0xf] %v733_v32  ;;  %118 = vst [vmem:[#allocation0 + $0x148] sm:$0xf] %v734_v33  ;;  %v735_v35 = vld [vmem:[%s1195_s0 + $0xa0] sm:$0xf] }
  0x18   :  { %v411_v36 = vld [vmem:[#allocation0 + $0x43] ss:$8 sm:$0xf]   ;;  %123 = vst [vmem:[#allocation0 + $0x140] sm:$0xf] %v735_v35 }
  0x19   :  { %v752_v37 = vld [vmem:[%s1195_s0 + $0x5c] sm:$0xf]  ;;  %v415_v38 = vsel %vm322_vm0, %v413_v34, %v411_v36  ;;  %v402_v39 = vld [vmem:[#allocation0 + $0x103] ss:$8 sm:$0xf0]  }
  0x1a   :  { %208 = vst [vmem:[#allocation0 + $0xb8] sm:$0xf] %v752_v37  ;;  %v753_v40 = vld [vmem:[%s1195_s0 + $0x58] sm:$0xf]  ;;  %416 = vrot.lane.b32.xlu1 %v415_v38, %s806_s10  ;;  %v754_v41 = vld [vmem:[%s1195_s0 + $0x54] sm:$0xf] }
  0x1b   :  { %213 = vst [vmem:[#allocation0 + $0xb0] sm:$0xf] %v753_v40  ;;  %v755_v42 = vld [vmem:[%s1195_s0 + $0x50] sm:$0xf]  ;;  %v756_v43 = vld [vmem:[%s1195_s0 + $0x4c] sm:$0xf] }
  0x1c   :  { %v400_v44 = vld [vmem:[#allocation0 + $0x103] ss:$8 sm:$0xf]   ;;  %218 = vst [vmem:[#allocation0 + $0xa8] sm:$0xf] %v754_v41 }
  0x1d   :  { %223 = vst [vmem:[#allocation0 + $0xa0] sm:$0xf] %v755_v42  ;;  %228 = vst [vmem:[#allocation0 + $0x98] sm:$0xf] %v756_v43  ;;  %v757_v45 = vld [vmem:[%s1195_s0 + $0x48] sm:$0xf]  ;;  %v404_v46 = vsel %vm322_vm0, %v402_v39, %v400_v44 }
  0x1e   :  { %233 = vst [vmem:[#allocation0 + $0x90] sm:$0xf] %v757_v45  ;;  %v758_v47 = vld [vmem:[%s1195_s0 + $0x44] sm:$0xf]  ;;  %v759_v48 = vld [vmem:[%s1195_s0 + $0x40] sm:$0xf]  ;;  %405 = vrot.lane.b32.xlu0 %v404_v46, %s806_s10 }
  0x1f   :  { %v720_v49 = vld [vmem:[%s1195_s0 + $0xdc] sm:$0xf]  ;;  %v424_v50 = vld [vmem:[#allocation0 + $0x143] ss:$8 sm:$0xf0]  }
  0x20   :  { %238 = vst [vmem:[#allocation0 + $0x88] sm:$0xf] %v758_v47  ;;  %243 = vst [vmem:[#allocation0 + $0x80] sm:$0xf] %v759_v48  ;;  %v721_v51 = vld [vmem:[%s1195_s0 + $0xd8] sm:$0xf] }
  0x21   :  { %48 = vst [vmem:[#allocation0 + $0x1b8] sm:$0xf] %v720_v49  ;;  %53 = vst [vmem:[#allocation0 + $0x1b0] sm:$0xf] %v721_v51  ;;  %v722_v52 = vld [vmem:[%s1195_s0 + $0xd4] sm:$0xf] }
  0x22   :  { %v723_v53 = vld [vmem:[%s1195_s0 + $0xd0] sm:$0xf]  ;;  %v724_v54 = vld [vmem:[%s1195_s0 + $0xcc] sm:$0xf]  ;;  %58 = vst [vmem:[#allocation0 + $0x1a8] sm:$0xf] %v722_v52 }
  0x23   :  { %v422_v55 = vld [vmem:[#allocation0 + $0x143] ss:$8 sm:$0xf]   ;;  %63 = vst [vmem:[#allocation0 + $0x1a0] sm:$0xf] %v723_v53 }
  0x24   :  { %68 = vst [vmem:[#allocation0 + $0x198] sm:$0xf] %v724_v54  ;;  %v725_v56 = vld [vmem:[%s1195_s0 + $0xc8] sm:$0xf]  ;;  %v426_v57 = vsel %vm322_vm0, %v424_v50, %v422_v55  ;;  %v726_v58 = vld [vmem:[%s1195_s0 + $0xc4] sm:$0xf] }
  0x25   :  { %73 = vst [vmem:[#allocation0 + $0x190] sm:$0xf] %v725_v56  ;;  %v727_v59 = vld [vmem:[%s1195_s0 + $0xc0] sm:$0xf]  ;;  %v744_v60 = vld [vmem:[%s1195_s0 + $0x7c] sm:$0xf]  ;;  %427 = vrot.lane.b32.xlu1 %v426_v57, %s806_s10 }
  0x26   :  { %78 = vst [vmem:[#allocation0 + $0x188] sm:$0xf] %v726_v58  ;;  %83 = vst [vmem:[#allocation0 + $0x180] sm:$0xf] %v727_v59  ;;  %v745_v61 = vld [vmem:[%s1195_s0 + $0x78] sm:$0xf] }
  0x27   :  { %168 = vst [vmem:[#allocation0 + $0xf8] sm:$0xf] %v744_v60  ;;  %v746_v62 = vld [vmem:[%s1195_s0 + $0x74] sm:$0xf]  ;;  %v747_v63 = vld [vmem:[%s1195_s0 + $0x70] sm:$0xf] }
  0x28   :  { %v435_v0 = vld [vmem:[#allocation0 + $0x83] ss:$8 sm:$0xf0]   ;;  %173 = vst [vmem:[#allocation0 + $0xf0] sm:$0xf] %v745_v61 }
  0x29   :  { %178 = vst [vmem:[#allocation0 + $0xe8] sm:$0xf] %v746_v62  ;;  %183 = vst [vmem:[#allocation0 + $0xe0] sm:$0xf] %v747_v63  ;;  %v748_v1 = vld [vmem:[%s1195_s0 + $0x6c] sm:$0xf] }
  0x2a   :  { %188 = vst [vmem:[#allocation0 + $0xd8] sm:$0xf] %v748_v1  ;;  %v749_v2 = vld [vmem:[%s1195_s0 + $0x68] sm:$0xf]  ;;  %v750_v3 = vld [vmem:[%s1195_s0 + $0x64] sm:$0xf] }
  0x2b   :  { %v751_v4 = vld [vmem:[%s1195_s0 + $0x60] sm:$0xf]  ;;  %193 = vst [vmem:[#allocation0 + $0xd0] sm:$0xf] %v749_v2  ;;  %198 = vst [vmem:[#allocation0 + $0xc8] sm:$0xf] %v750_v3 }
  0x2c   :  { %v433_v5 = vld [vmem:[#allocation0 + $0x83] ss:$8 sm:$0xf]   ;;  %203 = vst [vmem:[#allocation0 + $0xc0] sm:$0xf] %v751_v4 }
  0x2d   :  { %v712_v6 = vld [vmem:[%s1195_s0 + $0xfc] sm:$0xf]  ;;  %v437_v7 = vsel %vm322_vm0, %v435_v0, %v433_v5  ;;  %v713_v8 = vld [vmem:[%s1195_s0 + $0xf8] sm:$0xf]  ;;  %v714_v9 = vld [vmem:[%s1195_s0 + $0xf4] sm:$0xf] }
  0x2e   :  { %8 = vst [vmem:[#allocation0 + $0x1f8] sm:$0xf] %v712_v6  ;;  %v715_v10 = vld [vmem:[%s1195_s0 + $0xf0] sm:$0xf]  ;;  %438 = vrot.lane.b32.xlu0 %v437_v7, %s806_s10  ;;  %13 = vst [vmem:[#allocation0 + $0x1f0] sm:$0xf] %v713_v8 }
  0x2f   :  { %v446_v11 = vld [vmem:[#allocation0 + $0x183] ss:$8 sm:$0xf0]   ;;  %18 = vst [vmem:[#allocation0 + $0x1e8] sm:$0xf] %v714_v9 }
  0x30   :  { %23 = vst [vmem:[#allocation0 + $0x1e0] sm:$0xf] %v715_v10  ;;  %v716_v12 = vld [vmem:[%s1195_s0 + $0xec] sm:$0xf]  ;;  %v717_v13 = vld [vmem:[%s1195_s0 + $0xe8] sm:$0xf] }
  0x31   :  { %28 = vst [vmem:[#allocation0 + $0x1d8] sm:$0xf] %v716_v12  ;;  %v718_v14 = vld [vmem:[%s1195_s0 + $0xe4] sm:$0xf]  ;;  %v719_v15 = vld [vmem:[%s1195_s0 + $0xe0] sm:$0xf] }
  0x32   :  { %v444_v16 = vld [vmem:[#allocation0 + $0x183] ss:$8 sm:$0xf]   ;;  %33 = vst [vmem:[#allocation0 + $0x1d0] sm:$0xf] %v717_v13  ;;  %s807_s0 = smov 32  }
  0x33   :  { %38 = vst [vmem:[#allocation0 + $0x1c8] sm:$0xf] %v718_v14  ;;  %43 = vst [vmem:[#allocation0 + $0x1c0] sm:$0xf] %v719_v15  ;;  %v448_v17 = vsel %vm322_vm0, %v446_v11, %v444_v16 }
  0x34   :  { %v457_v18 = vld [vmem:[#allocation0 + $0xc3] ss:$8 sm:$0xf0]   ;;  %449 = vrot.lane.b32.xlu1 %v448_v17, %s806_s10  ;;  %v477_v19 = vld [vmem:[#allocation0 + $0x2] ss:$8 sm:$0xf]  }
  0x35   :  { %v455_v20 = vld [vmem:[#allocation0 + $0xc3] ss:$8 sm:$0xf]   ;;  %v479_v21 = vld [vmem:[#allocation0 + $0x2] ss:$8 sm:$0xf0]  }
  0x36   :  { %v459_v22 = vsel %vm322_vm0, %v457_v18, %v455_v20  ;;  %v487_v24 = vld [vmem:[#allocation0 + $0x102] ss:$8 sm:$0xf]   ;;  %v481_v25 = vsel %vm322_vm0, %v479_v21, %v477_v19  ;;  %v564_v45 = vld [vmem:[#allocation0 + $0x1] ss:$8 sm:$0xf]  }
  0x37   :  { %460 = vrot.lane.b32.xlu0 %v459_v22, %s806_s10  ;;  %v468_v23 = vld [vmem:[#allocation0 + $0x1c3] ss:$8 sm:$0xf0]   ;;  %v489_v26 = vld [vmem:[#allocation0 + $0x102] ss:$8 sm:$0xf0]  }
  0x38   :  { %v498_v27 = vld [vmem:[#allocation0 + $0x42] ss:$8 sm:$0xf]   ;;  %v491_v31 = vsel %vm322_vm0, %v489_v26, %v487_v24  ;;  %v566_v48 = vld [vmem:[#allocation0 + $0x1] ss:$8 sm:$0xf0]  }
  0x39   :  { %v500_v29 = vld [vmem:[#allocation0 + $0x42] ss:$8 sm:$0xf0]   ;;  %v320_v49 = vld [vmem:[#allocation0] ss:$8 sm:$0xf]   ;;  %v568_v63 = vsel %vm322_vm0, %v566_v48, %v564_v45 }
  0x3a   :  { %v466_v28 = vld [vmem:[#allocation0 + $0x1c3] ss:$8 sm:$0xf]   ;;  %v502_v32 = vsel %vm322_vm0, %v500_v29, %v498_v27  ;;  %v509_v33 = vld [vmem:[#allocation0 + $0x142] ss:$8 sm:$0xf]  }
  0x3b   :  { %v470_v30 = vsel %vm322_vm0, %v468_v23, %v466_v28  ;;  %482 = vrot.lane.b32.xlu0 %v481_v25, %s807_s0  ;;  %v511_v34 = vld [vmem:[#allocation0 + $0x142] ss:$8 sm:$0xf0]   ;;  %v321_v50 = vld [vmem:[#allocation0] ss:$8 sm:$0xf0]  }
  0x3c   :  { %471 = vrot.lane.b32.xlu1 %v470_v30, %s806_s10  ;;  %v520_v35 = vld [vmem:[#allocation0 + $0x82] ss:$8 sm:$0xf]   ;;  %v513_v37 = vsel %vm322_vm0, %v511_v34, %v509_v33  ;;  %v327_v51 = vld [vmem:[#allocation0 + $0x40] ss:$8 sm:$0xf]   ;;  %v323_v52 = vsel %vm322_vm0, %v321_v50, %v320_v49 }
  0x3d   :  { %v522_v36 = vld [vmem:[#allocation0 + $0x82] ss:$8 sm:$0xf0]   ;;  %v329_v53 = vld [vmem:[#allocation0 + $0x40] ss:$8 sm:$0xf0]  }
  0x3e   :  { %v524_v38 = vsel %vm322_vm0, %v522_v36, %v520_v35  ;;  %v531_v39 = vld [vmem:[#allocation0 + $0x182] ss:$8 sm:$0xf]   ;;  %v354_v54 = vld [vmem:[#allocation0 + $0x100] ss:$8 sm:$0xf]   ;;  %v331_v59 = vsel %vm322_vm0, %v329_v53, %v327_v51 }
  0x3f   :  { %503 = vrot.lane.b32.xlu0 %v502_v32, %s807_s0  ;;  %v533_v40 = vld [vmem:[#allocation0 + $0x182] ss:$8 sm:$0xf0]   ;;  %v574_v55 = vld [vmem:[#allocation0 + $0x101] ss:$8 sm:$0xf]  }
  0x40   :  { %492 = vrot.lane.b32.xlu1 %v491_v31, %s807_s0  ;;  %v542_v41 = vld [vmem:[#allocation0 + $0xc2] ss:$8 sm:$0xf]   ;;  %v535_v46 = vsel %vm322_vm0, %v533_v40, %v531_v39  ;;  %v576_v56 = vld [vmem:[#allocation0 + $0x101] ss:$8 sm:$0xf0]  }
  0x41   :  { %v544_v42 = vld [vmem:[#allocation0 + $0xc2] ss:$8 sm:$0xf0]   ;;  %v585_v57 = vld [vmem:[#allocation0 + $0x41] ss:$8 sm:$0xf]   ;;  %v578_v13 = vsel %vm322_vm0, %v576_v56, %v574_v55 }
  0x42   :  { %v553_v43 = vld [vmem:[#allocation0 + $0x1c2] ss:$8 sm:$0xf]   ;;  %v546_v47 = vsel %vm322_vm0, %v544_v42, %v542_v41  ;;  %v587_v58 = vld [vmem:[#allocation0 + $0x41] ss:$8 sm:$0xf0]  }
  0x43   :  { %525 = vrot.lane.b32.xlu0 %v524_v38, %s807_s0  ;;  %v555_v44 = vld [vmem:[#allocation0 + $0x1c2] ss:$8 sm:$0xf0]   ;;  %325 = vst.msk [vmem:[%s1196_s1] sm:$0xff] %vm324_vm1, %v323_v52   ;;  %775 = vst.msk [vmem:[%s1196_s1 + $0x8] sm:$0xff] %vm324_vm1, %v331_v59   ;;  %v589_v14 = vsel %vm322_vm0, %v587_v58, %v585_v57 }
  0x44   :  { %514 = vrot.lane.b32.xlu1 %v513_v37, %s807_s0  ;;  %v356_v60 = vld [vmem:[#allocation0 + $0x100] ss:$8 sm:$0xf0]   ;;  %v557_v62 = vsel %vm322_vm0, %v555_v44, %v553_v43  ;;  %v596_v9 = vld [vmem:[#allocation0 + $0x141] ss:$8 sm:$0xf]  }
  0x45   :  { %v363_v61 = vld [vmem:[#allocation0 + $0x140] ss:$8 sm:$0xf]   ;;  %v358_v0 = vsel %vm322_vm0, %v356_v60, %v354_v54  ;;  %v598_v15 = vld [vmem:[#allocation0 + $0x141] ss:$8 sm:$0xf0]  }
  0x46   :  { %v365_v1 = vld [vmem:[#allocation0 + $0x140] ss:$8 sm:$0xf0]   ;;  %778 = vst.msk [vmem:[%s1196_s1 + $0x20] sm:$0xff] %vm324_vm1, %v358_v0   ;;  %v600_v21 = vsel %vm322_vm0, %v598_v15, %v596_v9 }
  0x47   :  { %547 = vrot.lane.b32.xlu0 %v546_v47, %s807_s0  ;;  %v336_v2 = vld [vmem:[#allocation0 + $0x80] ss:$8 sm:$0xf]   ;;  %v367_v3 = vsel %vm322_vm0, %v365_v1, %v363_v61  ;;  %v607_v18 = vld [vmem:[#allocation0 + $0x81] ss:$8 sm:$0xf]  }
  0x48   :  { %536 = vrot.lane.b32.xlu1 %v535_v46, %s807_s0  ;;  %v338_v4 = vld [vmem:[#allocation0 + $0x80] ss:$8 sm:$0xf0]   ;;  %779 = vst.msk [vmem:[%s1196_s1 + $0x28] sm:$0xff] %vm324_vm1, %v367_v3  }
  0x49   :  { %v372_v5 = vld [vmem:[#allocation0 + $0x180] ss:$8 sm:$0xf]   ;;  %v340_v6 = vsel %vm322_vm0, %v338_v4, %v336_v2  ;;  %v609_v19 = vld [vmem:[#allocation0 + $0x81] ss:$8 sm:$0xf0]  }
  0x4a   :  { %v374_v7 = vld [vmem:[#allocation0 + $0x180] ss:$8 sm:$0xf0]   ;;  %776 = vst.msk [vmem:[%s1196_s1 + $0x10] sm:$0xff] %vm324_vm1, %v340_v6   ;;  %v611_v22 = vsel %vm322_vm0, %v609_v19, %v607_v18 }
  0x4b   :  { %v345_v8 = vld [vmem:[#allocation0 + $0xc0] ss:$8 sm:$0xf]   ;;  %569 = vrot.lane.b32.xlu0 %v568_v63, %s808_s28  ;;  %v376_v10 = vsel %vm322_vm0, %v374_v7, %v372_v5  ;;  %v618_v23 = vld [vmem:[#allocation0 + $0x181] ss:$8 sm:$0xf]  }
  0x4c   :  { %558 = vrot.lane.b32.xlu1 %v557_v62, %s807_s0  ;;  %v347_v11 = vld [vmem:[#allocation0 + $0xc0] ss:$8 sm:$0xf0]   ;;  %780 = vst.msk [vmem:[%s1196_s1 + $0x30] sm:$0xff] %vm324_vm1, %v376_v10  }
  0x4d   :  { %v381_v12 = vld [vmem:[#allocation0 + $0x1c0] ss:$8 sm:$0xf]   ;;  %v349_v16 = vsel %vm322_vm0, %v347_v11, %v345_v8  ;;  %v620_v24 = vld [vmem:[#allocation0 + $0x181] ss:$8 sm:$0xf0]  }
  0x4e   :  { %v383_v17 = vld [vmem:[#allocation0 + $0x1c0] ss:$8 sm:$0xf0]   ;;  %777 = vst.msk [vmem:[%s1196_s1 + $0x18] sm:$0xff] %vm324_vm1, %v349_v16   ;;  %v622_v27 = vsel %vm322_vm0, %v620_v24, %v618_v23 }
  0x4f   :  { %v385_v20 = vsel %vm322_vm0, %v383_v17, %v381_v12  ;;  %590 = vrot.lane.b32.xlu0 %v589_v14, %s808_s28  ;;  %v629_v25 = vld [vmem:[#allocation0 + $0xc1] ss:$8 sm:$0xf]  }
  0x50   :  { %781 = vst.msk [vmem:[%s1196_s1 + $0x38] sm:$0xff] %vm324_vm1, %v385_v20   ;;  %579 = vrot.lane.b32.xlu1 %v578_v13, %s808_s28  ;;  %v631_v26 = vld [vmem:[#allocation0 + $0xc1] ss:$8 sm:$0xf0]  }
  0x51   :  { %v633_v28 = vsel %vm322_vm0, %v631_v26, %v629_v25  ;;  %v640_v29 = vld [vmem:[#allocation0 + $0x1c1] ss:$8 sm:$0xf]  }
  0x52   :  { %v642_v30 = vld [vmem:[#allocation0 + $0x1c1] ss:$8 sm:$0xf0]  }
  0x53   :  { %612 = vrot.lane.b32.xlu0 %v611_v22, %s808_s28  ;;  %v644_v31 = vsel %vm322_vm0, %v642_v30, %v640_v29 }
  0x54   :  { %601 = vrot.lane.b32.xlu1 %v600_v21, %s808_s28 }
  0x57   :  { %634 = vrot.lane.b32.xlu0 %v633_v28, %s808_s28 }
  0x58   :  { %623 = vrot.lane.b32.xlu1 %v622_v27, %s808_s28 }
  0x5c   :  { %645 = vrot.lane.b32.xlu1 %v644_v31, %s808_s28 }
  0x87   :  { %v396_v32 = vpop.permute.xlu0 %395  }
  0x88   :  { %398 = vst.msk [vmem:[%s1196_s1] sm:$0xff] %vm397_vm2, %v396_v32  }
  0x8c   :  { %v417_v33 = vpop.permute.xlu1 %416  }
  0x8d   :  { %783 = vst.msk [vmem:[%s1196_s1 + $0x8] sm:$0xff] %vm397_vm2, %v417_v33  }
  0x90   :  { %v406_v34 = vpop.permute.xlu0 %405  }
  0x91   :  { %782 = vst.msk [vmem:[%s1196_s1 + $0x20] sm:$0xff] %vm397_vm2, %v406_v34  }
  0x97   :  { %v428_v35 = vpop.permute.xlu1 %427  }
  0x98   :  { %784 = vst.msk [vmem:[%s1196_s1 + $0x28] sm:$0xff] %vm397_vm2, %v428_v35  }
  0xa0   :  { %v439_v36 = vpop.permute.xlu0 %438  }
  0xa1   :  { %785 = vst.msk [vmem:[%s1196_s1 + $0x10] sm:$0xff] %vm397_vm2, %v439_v36  }
  0xa6   :  { %v450_v37 = vpop.permute.xlu1 %449  }
  0xa7   :  { %786 = vst.msk [vmem:[%s1196_s1 + $0x30] sm:$0xff] %vm397_vm2, %v450_v37  }
  0xa9   :  { %v461_v38 = vpop.permute.xlu0 %460  }
  0xaa   :  { %787 = vst.msk [vmem:[%s1196_s1 + $0x18] sm:$0xff] %vm397_vm2, %v461_v38  }
  0xad   :  { %v483_v40 = vpop.permute.xlu0 %482  }
  0xae   :  { %v472_v39 = vpop.permute.xlu1 %471   ;;  %485 = vst.msk [vmem:[%s1196_s1] sm:$0xff] %vm484_vm3, %v483_v40  }
  0xaf   :  { %788 = vst.msk [vmem:[%s1196_s1 + $0x38] sm:$0xff] %vm397_vm2, %v472_v39  }
  0xb1   :  { %v504_v42 = vpop.permute.xlu0 %503  }
  0xb2   :  { %v493_v41 = vpop.permute.xlu1 %492   ;;  %790 = vst.msk [vmem:[%s1196_s1 + $0x8] sm:$0xff] %vm484_vm3, %v504_v42  }
  0xb3   :  { %789 = vst.msk [vmem:[%s1196_s1 + $0x20] sm:$0xff] %vm484_vm3, %v493_v41  }
  0xb5   :  { %v526_v44 = vpop.permute.xlu0 %525  }
  0xb6   :  { %v515_v43 = vpop.permute.xlu1 %514   ;;  %792 = vst.msk [vmem:[%s1196_s1 + $0x10] sm:$0xff] %vm484_vm3, %v526_v44  }
  0xb7   :  { %791 = vst.msk [vmem:[%s1196_s1 + $0x28] sm:$0xff] %vm484_vm3, %v515_v43  }
  0xb9   :  { %v548_v46 = vpop.permute.xlu0 %547  }
  0xba   :  { %v537_v45 = vpop.permute.xlu1 %536   ;;  %794 = vst.msk [vmem:[%s1196_s1 + $0x18] sm:$0xff] %vm484_vm3, %v548_v46  }
  0xbb   :  { %793 = vst.msk [vmem:[%s1196_s1 + $0x30] sm:$0xff] %vm484_vm3, %v537_v45  }
  0xbd   :  { %v570_v48 = vpop.permute.xlu0 %569  }
  0xbe   :  { %v559_v47 = vpop.permute.xlu1 %558   ;;  %572 = vst.msk [vmem:[%s1196_s1] sm:$0xff] %vm571_vm4, %v570_v48  }
  0xbf   :  { %795 = vst.msk [vmem:[%s1196_s1 + $0x38] sm:$0xff] %vm484_vm3, %v559_v47  }
  0xc1   :  { %v591_v50 = vpop.permute.xlu0 %590  }
  0xc2   :  { %v580_v49 = vpop.permute.xlu1 %579   ;;  %797 = vst.msk [vmem:[%s1196_s1 + $0x8] sm:$0xff] %vm571_vm4, %v591_v50  }
  0xc3   :  { %796 = vst.msk [vmem:[%s1196_s1 + $0x20] sm:$0xff] %vm571_vm4, %v580_v49  }
  0xc5   :  { %v613_v52 = vpop.permute.xlu0 %612  }
  0xc6   :  { %v602_v51 = vpop.permute.xlu1 %601   ;;  %799 = vst.msk [vmem:[%s1196_s1 + $0x10] sm:$0xff] %vm571_vm4, %v613_v52  }
  0xc7   :  { %798 = vst.msk [vmem:[%s1196_s1 + $0x28] sm:$0xff] %vm571_vm4, %v602_v51  }
  0xc9   :  { %v635_v54 = vpop.permute.xlu0 %634  }
  0xca   :  { %v624_v53 = vpop.permute.xlu1 %623   ;;  %801 = vst.msk [vmem:[%s1196_s1 + $0x18] sm:$0xff] %vm571_vm4, %v635_v54  }
  0xcb   :  { %800 = vst.msk [vmem:[%s1196_s1 + $0x30] sm:$0xff] %vm571_vm4, %v624_v53  }
  0xce   :  { %v646_v55 = vpop.permute.xlu1 %645  }
  0xcf   :  { %802 = vst.msk [vmem:[%s1196_s1 + $0x38] sm:$0xff] %vm571_vm4, %v646_v55  }

// kernel: tile.16
= control target key start
LH: loop header
LB: loop body
LE: loop exit
PB: predicated region body
PF: predicated region fallthrough
CT: control target
= control target key end

     0   :  { %vm7_vm0 = vcmask 523264   ;;  %vm13_vm1 = vcmask 1048064   ;;  %s39_s0 = inlined_call_operand.vmem [shape: f32[2,64], index: 0, kind: input, shape index: {}]   ;;  %s40_s1 = inlined_call_operand.vmem [shape: f32[1,128], index: 1, kind: output, shape index: {}]  }
   0x1   :  { %v4_v0 = vld [vmem:[%s39_s0] sm:$0x3]  ;;  %s22_s0 = smov 64  }
   0x2   :  { %5 = vst [vmem:[#allocation1] sm:$0x3] %v4_v0 }
   0x9   :  { %v10_v1 = vld [vmem:[#allocation1 + $0x1] sm:$0x1]   ;;  %v6_v2 = vld [vmem:[#allocation1] sm:$0x1]  }
   0xa   :  { %11 = vrot.lane.b32.xlu0 %v10_v1, %s22_s0  ;;  %8 = vst.msk [vmem:[#allocation0] sm:$0x1] %vm7_vm0, %v6_v2  }
  0x7c   :  { %v12_v3 = vpop.permute.xlu0 %11  }
  0x7d   :  { %14 = vst.msk [vmem:[#allocation0] sm:$0x1] %vm13_vm1, %v12_v3  }
  0x84   :  { %v18_v4 = vld [vmem:[#allocation0] sm:$0x1] }
  0x85   :  { %20 = vst [vmem:[%s40_s1] sm:$0x1] %v18_v4 }

// kernel: pooling_layer_forward.1
= control target key start
LH: loop header
LB: loop body
LE: loop exit
PB: predicated region body
PF: predicated region fallthrough
CT: control target
= control target key end

     0   :  { %vm1467_vm0 = vcmask 97280   ;;  %vm1474_vm1 = vcmask 1043456   ;;  %vm3287_vm2 = vcmask 64512   ;;  %vm3800_vm3 = vcmask 1041408   ;;  %s8031_s2 = inlined_call_operand.vmem [shape: f32[128,128], index: 2, kind: input, shape index: {}]   ;;  %s8032_s0 = inlined_call_operand.vmem [shape: f32[1,12,128], index: 0, kind: input, shape index: {}]   ;;  %s8033_s4 = inlined_call_operand.vmem [shape: f32[128,128], index: 4, kind: input, shape index: {}]   ;;  %s8034_s5 = inlined_call_operand.vmem [shape: f32[12,12], index: 5, kind: input, shape index: {}]   ;;  %s8035_s3 = inlined_call_operand.vmem [shape: f32[128,128], index: 3, kind: input, shape index: {}]   ;;  %s8036_s8 = inlined_call_operand.vmem [shape: f32[128,8], index: 8, kind: input, shape index: {}]   ;;  %s8037_s6 = inlined_call_operand.vmem [shape: f32[12,12], index: 6, kind: input, shape index: {}]   ;;  %s8038_s7 = inlined_call_operand.vmem [shape: f32[1,128], index: 7, kind: input, shape index: {}]   ;;  %s8039_s9 = inlined_call_operand.vmem [shape: f32[8,2], index: 9, kind: input, shape index: {}]   ;;  %s8040_s11 = inlined_call_operand.vmem [shape: f32[2,128], index: 11, kind: input, shape index: {}]   ;;  %s8041_s10 = inlined_call_operand.vmem [shape: f32[1,2], index: 10, kind: input, shape index: {}]   ;;  %s8042_s1 = inlined_call_operand.vmem [shape: f32[1,16,128], index: 1, kind: input, shape index: {}]   ;;  %s8043_s13 = inlined_call_operand.vmem [shape: f32[12,16], index: 13, kind: input, shape index: {}]   ;;  %s8044_s12 = inlined_call_operand.vmem [shape: f32[1,128], index: 12, kind: input, shape index: {}]   ;;  %s8045_s14 = inlined_call_operand.vmem [shape: f32[1,12,128], index: 14, kind: output, shape index: {}]  }
   0x1   :  { %v49_v0 = vld [vmem:[%s8031_s2] sm:$0xff]  ;;  %v50_v1 = vld [vmem:[%s8031_s2 + $0x8] sm:$0xff]  ;;  %v51_v2 = vld [vmem:[%s8031_s2 + $0x10] sm:$0xff]  ;;  %vm3793_vm4 = vcmask 15360   ;;  %vm4311_vm5 = vcmask 130048  }
   0x2   :  { %v66_v3 = vand.u32 4294901760, %v49_v0  ;;  %v69_v4 = vand.u32 4294901760, %v50_v1  ;;  %v52_v5 = vld [vmem:[%s8031_s2 + $0x18] sm:$0xff]  ;;  %v72_v6 = vand.u32 4294901760, %v51_v2  ;;  %v53_v7 = vld [vmem:[%s8031_s2 + $0x20] sm:$0xff]  ;;  %v54_v8 = vld [vmem:[%s8031_s2 + $0x28] sm:$0xff] }
   0x3   :  { %v75_v9 = vand.u32 4294901760, %v52_v5  ;;  %v78_v10 = vand.u32 4294901760, %v53_v7  ;;  %v81_v11 = vand.u32 4294901760, %v54_v8  ;;  %v55_v12 = vld [vmem:[%s8031_s2 + $0x30] sm:$0xff]  ;;  %v56_v13 = vld [vmem:[%s8031_s2 + $0x38] sm:$0xff]  ;;  %v57_v25 = vld [vmem:[%s8031_s2 + $0x40] sm:$0xff] }
   0x4   :  { %v7009_v14 = vpack.c.bf16 %v69_v4, %v66_v3  ;;  %v7011_v15 = vsub.f32 %v49_v0, %v66_v3  ;;  %v7013_v16 = vsub.f32 %v50_v1, %v69_v4  ;;  %v7015_v17 = vsub.f32 %v51_v2, %v72_v6  ;;  %v58_v27 = vld [vmem:[%s8031_s2 + $0x48] sm:$0xff]  ;;  %v47_v30 = vld [vmem:[%s8032_s0] sm:$0xff]  ;;  %v59_v35 = vld [vmem:[%s8031_s2 + $0x50] sm:$0xff] }
   0x5   :  { %v7017_v18 = vpack.c.bf16 %v75_v9, %v72_v6  ;;  %v7019_v19 = vsub.f32 %v52_v5, %v75_v9  ;;  %v7021_v20 = vsub.f32 %v53_v7, %v78_v10  ;;  %v7026_v22 = vsub.f32 %v54_v8, %v81_v11  ;;  %v60_v36 = vld [vmem:[%s8031_s2 + $0x58] sm:$0xff]  ;;  %v61_v44 = vld [vmem:[%s8031_s2 + $0x60] sm:$0xff]  ;;  %v62_v46 = vld [vmem:[%s8031_s2 + $0x68] sm:$0xff] }
   0x6   :  { %6135 = vmatprep.subr.bf16.mxu1 %v7009_v14  ;;  %v6198_v21 = vpack.c.bf16 %v7013_v16, %v7011_v15  ;;  %v84_v23 = vand.u32 4294901760, %v55_v12  ;;  %v87_v24 = vand.u32 4294901760, %v56_v13  ;;  %v7038_v28 = vpack.c.bf16 %v81_v11, %v78_v10  ;;  %v48_v47 = vld [vmem:[%s8032_s0 + $0x8] sm:$0xf]  ;;  %v63_v55 = vld [vmem:[%s8031_s2 + $0x70] sm:$0xff]  ;;  %v64_v58 = vld [vmem:[%s8031_s2 + $0x78] sm:$0xff] }
   0x7   :  { %6137 = vmatpush3.bf16.msra.mxu1 %v7009_v14  ;;  %v6202_v26 = vpack.c.bf16 %v7019_v19, %v7015_v17  ;;  %v90_v29 = vand.u32 4294901760, %v57_v25  ;;  %v6206_v31 = vpack.c.bf16 %v7026_v22, %v7021_v20  ;;  %v93_v34 = vand.u32 4294901760, %v58_v27 }
   0x8   :  { %6199 = vmatprep.subr.bf16.mxu0 %v6198_v21  ;;  %6139 = vmatprep.subr.bf16.mxu1 %v7017_v18  ;;  %v7045_v32 = vsub.f32 %v55_v12, %v84_v23  ;;  %v7047_v33 = vsub.f32 %v56_v13, %v87_v24  ;;  %v7057_v37 = vpack.c.bf16 %v87_v24, %v84_v23  ;;  %v7059_v38 = vand.u32 4294901760, %v47_v30 }
   0x9   :  { %6201 = vmatpush3.bf16.msra.mxu0 %v6198_v21  ;;  %v96_v39 = vand.u32 4294901760, %v59_v35  ;;  %v99_v40 = vand.u32 4294901760, %v60_v36  ;;  %v7063_v42 = vsub.f32 %v57_v25, %v90_v29  ;;  %v7065_v43 = vsub.f32 %v58_v27, %v93_v34 }
   0xa   :  { %6203 = vmatprep.subr.bf16.mxu0 %v6202_v26  ;;  %v6210_v41 = vpack.c.bf16 %v7047_v33, %v7045_v32  ;;  %v7071_v45 = vsub.f32 %v47_v30, %v7059_v38  ;;  %v7081_v48 = vpack.c.bf16 %v93_v34, %v90_v29  ;;  %v102_v52 = vand.u32 4294901760, %v61_v44 }
   0xb   :  { %6141 = vmatpush3.bf16.msra.mxu1 %v7017_v18  ;;  %v7087_v50 = vsub.f32 %v59_v35, %v96_v39  ;;  %v7089_v51 = vsub.f32 %v60_v36, %v99_v40  ;;  %v6214_v53 = vpack.c.bf16 %v7065_v43, %v7063_v42  ;;  %v105_v54 = vand.u32 4294901760, %v62_v46 }
   0xc   :  { %6143 = vmatprep.subr.bf16.mxu1 %v7038_v28  ;;  %v7084_v49 = vand.u32 4294901760, %v7071_v45  ;;  %5385 = vmatprep.mubr.f32.mxu0 %v7071_v45  ;;  %v7098_v57 = vand.u32 4294901760, %v48_v47  ;;  %v7105_v59 = vpack.c.bf16 %v99_v40, %v96_v39  ;;  %v169_v61 = vand.u32 4294901760, %v7011_v15 }
   0xd   :  { %6205 = vmatpush3.bf16.msra.mxu0 %v6202_v26  ;;  %v176_v62 = vand.u32 4294901760, %v7013_v16  ;;  %v6218_v63 = vpack.c.bf16 %v7089_v51, %v7087_v50  ;;  %v108_v0 = vand.u32 4294901760, %v63_v55  ;;  %v7113_v1 = vsub.f32 %v61_v44, %v102_v52 }
   0xe   :  { %6207 = vmatprep.subr.bf16.mxu0 %v6206_v31  ;;  %v149_v56 = vsub.f32 %v7071_v45, %v7084_v49  ;;  %v7115_v2 = vsub.f32 %v62_v46, %v105_v54  ;;  %v111_v3 = vand.u32 4294901760, %v64_v58  ;;  %v7119_v4 = vsub.f32 %v48_v47, %v7098_v57 }
   0xf   :  { %6145 = vmatpush3.bf16.msra.mxu1 %v7038_v28  ;;  %v7122_v5 = vpack.c.bf16 %v105_v54, %v102_v52  ;;  %v170_v6 = vsub.f32 %v7011_v15, %v169_v61  ;;  %v177_v7 = vsub.f32 %v7013_v16, %v176_v62  ;;  %v183_v8 = vand.u32 4294901760, %v7015_v17  ;;  %v771_v15 = vld [vmem:[%s8033_s4 + $0x30] sm:$0xff]  ;;  %v772_v16 = vld [vmem:[%s8033_s4 + $0x38] sm:$0xff] }
  0x10   :  { %6147 = vmatprep.subr.bf16.mxu1 %v7057_v37  ;;  %v7107_v60 = vand.u32 4294901760, %v149_v56  ;;  %v190_v9 = vand.u32 4294901760, %v7019_v19  ;;  %v6222_v10 = vpack.c.bf16 %v7115_v2, %v7113_v1  ;;  %v7135_v11 = vsub.f32 %v63_v55, %v108_v0 }
  0x11   :  { %6209 = vmatpush3.bf16.msra.mxu0 %v6206_v31  ;;  %v7137_v12 = vsub.f32 %v64_v58, %v111_v3  ;;  %v7140_v13 = vand.u32 4294901760, %v7119_v4  ;;  %v7143_v21 = vpack.c.bf16 %v111_v3, %v108_v0  ;;  %v197_v23 = vand.u32 4294901760, %v7021_v20 }
  0x12   :  { %6211 = vmatprep.subr.bf16.mxu0 %v6210_v41  ;;  %8066 = vst [vmem:[#allocation2_spill] sm:$0xff] %v7107_v60  ;;  %5315 = vmatprep.mubr.f32.mxu1 %v7107_v60  ;;  %v204_v24 = vand.u32 4294901760, %v7026_v22  ;;  %v171_v25 = vand.u32 4294901760, %v170_v6  ;;  %v178_v26 = vand.u32 4294901760, %v177_v7  ;;  %v184_v27 = vsub.f32 %v7015_v17, %v183_v8 }
  0x13   :  { %6149 = vmatpush3.bf16.msra.mxu1 %v7057_v37  ;;  %v191_v29 = vsub.f32 %v7019_v19, %v190_v9  ;;  %v6226_v30 = vpack.c.bf16 %v7137_v12, %v7135_v11  ;;  %v159_v31 = vsub.f32 %v7119_v4, %v7140_v13  ;;  %v198_v34 = vsub.f32 %v7021_v20, %v197_v23  ;;  %v773_v19 = vld [vmem:[%s8033_s4 + $0x40] sm:$0xff]  ;;  %v775_v20 = vld [vmem:[%s8033_s4 + $0x50] sm:$0xff] }
  0x14   :  { %6151 = vmatprep.subr.bf16.mxu1 %v7081_v48  ;;  %v205_v35 = vsub.f32 %v7026_v22, %v204_v24  ;;  %v211_v36 = vand.u32 4294901760, %v7045_v32  ;;  %v6166_v39 = vpack.c.bf16 %v178_v26, %v171_v25  ;;  %v185_v40 = vand.u32 4294901760, %v184_v27  ;;  %v776_v22 = vld [vmem:[%s8033_s4 + $0x58] sm:$0xff] }
  0x15   :  { %6213 = vmatpush3.bf16.msra.mxu0 %v6210_v41  ;;  %v192_v41 = vand.u32 4294901760, %v191_v29  ;;  %v218_v44 = vand.u32 4294901760, %v7047_v33  ;;  %v7168_v46 = vand.u32 4294901760, %v159_v31  ;;  %v199_v47 = vand.u32 4294901760, %v198_v34 }
  0x16   :  { %6215 = vmatprep.subr.bf16.mxu0 %v6214_v53  ;;  %v206_v52 = vand.u32 4294901760, %v205_v35  ;;  %v225_v56 = vand.u32 4294901760, %v7063_v42  ;;  %v232_v58 = vand.u32 4294901760, %v7065_v43  ;;  %v239_v3 = vand.u32 4294901760, %v7087_v50 }
  0x17   :  { %6153 = vmatpush3.bf16.msra.mxu1 %v7081_v48  ;;  %v6170_v54 = vpack.c.bf16 %v192_v41, %v185_v40  ;;  %v219_v55 = vsub.f32 %v7047_v33, %v218_v44  ;;  %v246_v25 = vand.u32 4294901760, %v7089_v51  ;;  %v8051_v27 = vand.u32 4294901760, %v7113_v1  ;;  %v778_v33 = vld [vmem:[%s8033_s4 + $0x68] sm:$0xff] }
  0x18   :  { %6155 = vmatprep.subr.bf16.mxu1 %v7105_v59  ;;  %v226_v7 = vsub.f32 %v7063_v42, %v225_v56  ;;  %v240_v26 = vsub.f32 %v7087_v50, %v239_v3  ;;  %v8048_v29 = vand.u32 4294901760, %v7115_v2  ;;  %v8047_v41 = vand.u32 4294901760, %v7135_v11  ;;  %v779_v42 = vld [vmem:[%s8033_s4 + $0x70] sm:$0xff] }
  0x19   :  { %6217 = vmatpush3.bf16.msra.mxu0 %v6214_v53  ;;  %v212_v53 = vsub.f32 %v7045_v32, %v211_v36  ;;  %v220_v6 = vand.u32 4294901760, %v219_v55  ;;  %v247_v35 = vsub.f32 %v7089_v51, %v246_v25  ;;  %v254_v40 = vsub.f32 %v7113_v1, %v8051_v27  ;;  %v777_v32 = vld [vmem:[%s8033_s4 + $0x60] sm:$0xff] }
  0x1a   :  { %6219 = vmatprep.subr.bf16.mxu0 %v6218_v63  ;;  %v227_v31 = vand.u32 4294901760, %v226_v7  ;;  %v268_v55 = vsub.f32 %v7135_v11, %v8047_v41 }
  0x1b   :  { %6157 = vmatpush3.bf16.msra.mxu1 %v7105_v59  ;;  %v213_v0 = vand.u32 4294901760, %v212_v53  ;;  %v261_v53 = vsub.f32 %v7115_v2, %v8048_v29  ;;  %v803_v29 = vand.u32 4294901760, %v772_v16 }
  0x1c   :  { %6159 = vmatprep.subr.bf16.mxu1 %v7122_v5 }
  0x1d   :  { %6221 = vmatpush3.bf16.msra.mxu0 %v6218_v63  ;;  %v6174_v63 = vpack.c.bf16 %v206_v52, %v199_v47  ;;  %v248_v52 = vand.u32 4294901760, %v247_v35 }
  0x1e   :  { %6223 = vmatprep.subr.bf16.mxu0 %v6222_v10 }
  0x1f   :  { %6161 = vmatpush3.bf16.msra.mxu1 %v7122_v5 }
  0x20   :  { %6163 = vmatprep.subr.bf16.mxu1 %v7143_v21 }
  0x21   :  { %6225 = vmatpush3.bf16.msra.mxu0 %v6222_v10  ;;  %v233_v10 = vsub.f32 %v7065_v43, %v232_v58  ;;  %v780_v43 = vld [vmem:[%s8033_s4 + $0x78] sm:$0xff] }
  0x22   :  { %6227 = vmatprep.subr.bf16.mxu0 %v6226_v30 }
  0x23   :  { %6165 = vmatpush3.bf16.msra.mxu1 %v7143_v21  ;;  %v234_v34 = vand.u32 4294901760, %v233_v10 }
  0x24   :  { %6167 = vmatprep.subr.bf16.mxu1 %v6166_v39 }
  0x25   :  { %6229 = vmatpush3.bf16.msra.mxu0 %v6226_v30  ;;  %v6178_v30 = vpack.c.bf16 %v220_v6, %v213_v0  ;;  %v6182_v47 = vpack.c.bf16 %v234_v34, %v227_v31  ;;  %v255_v0 = vand.u32 4294901760, %v254_v40  ;;  %v262_v6 = vand.u32 4294901760, %v261_v53  ;;  %v765_v31 = vld [vmem:[%s8033_s4] sm:$0xff]  ;;  %v766_v34 = vld [vmem:[%s8033_s4 + $0x8] sm:$0xff] }
  0x26   :  { %5316 = vmatmul.mubr.f32.vlgmr.msra.gmra.mrb[0].mxu1 %v7168_v46  ;;  %6231 = vmatprep.subr.bf16.mxu0 %v7009_v14  ;;  %v782_v35 = vand.u32 4294901760, %v765_v31 }
  0x27   :  { %6169 = vmatpush3.bf16.msra.mxu1 %v6166_v39  ;;  %5350 = vmatprep.mubr.f32.mxu1 %v7059_v38  ;;  %v241_v39 = vand.u32 4294901760, %v240_v26  ;;  %v6190_v10 = vpack.c.bf16 %v262_v6, %v255_v0  ;;  %v269_v26 = vand.u32 4294901760, %v268_v55 }
  0x28   :  { %5386 = vmatmul.mubr.f32.vlgmr.msra.gmra.mrb[0].mxu0 %v7119_v4  ;;  %6171 = vmatprep.subr.bf16.mxu1 %v6170_v54  ;;  %v7237_v53 = vsub.f32 %v765_v31, %v782_v35 }
  0x29   :  { %6233 = vmatpush3.bf16.msra.mxu0 %v7009_v14  ;;  %5420 = vmatprep.mubr.f32.mxu0 %v7084_v49 }
  0x2a   :  { %6235 = vmatprep.subr.bf16.mxu0 %v7017_v18 }
  0x2b   :  { %6173 = vmatpush3.bf16.msra.mxu1 %v6170_v54  ;;  %v8046_v54 = vand.u32 4294901760, %v7137_v12 }
  0x2c   :  { %6175 = vmatprep.subr.bf16.mxu1 %v6174_v63 }
  0x2d   :  { %6237 = vmatpush3.bf16.msra.mxu0 %v7017_v18  ;;  %v275_v7 = vsub.f32 %v7137_v12, %v8046_v54 }
  0x2e   :  { %6239 = vmatprep.subr.bf16.mxu0 %v7038_v28 }
  0x2f   :  { %6177 = vmatpush3.bf16.msra.mxu1 %v6174_v63  ;;  %v6186_v63 = vpack.c.bf16 %v248_v52, %v241_v39  ;;  %v785_v39 = vand.u32 4294901760, %v766_v34  ;;  %v768_v52 = vld [vmem:[%s8033_s4 + $0x18] sm:$0xff] }
  0x30   :  { %6179 = vmatprep.subr.bf16.mxu1 %v6178_v30  ;;  %v791_v0 = vand.u32 4294901760, %v768_v52 }
  0x31   :  { %6241 = vmatpush3.bf16.msra.mxu0 %v7038_v28  ;;  %v7239_v55 = vsub.f32 %v766_v34, %v785_v39  ;;  %v7242_v6 = vpack.c.bf16 %v785_v39, %v782_v35  ;;  %v6262_v35 = vpack.c.bf16 %v176_v62, %v169_v61 }
  0x32   :  { %6243 = vmatprep.subr.bf16.mxu0 %v7057_v37  ;;  %v7255_v34 = vsub.f32 %v768_v52, %v791_v0 }
  0x33   :  { %6181 = vmatpush3.bf16.msra.mxu1 %v6178_v30  ;;  %v276_v30 = vand.u32 4294901760, %v275_v7  ;;  %v769_v7 = vld [vmem:[%s8033_s4 + $0x20] sm:$0xff]  ;;  %v892_v31 = vand.u32 4294901760, %v7239_v55 }
  0x34   :  { %6183 = vmatprep.subr.bf16.mxu1 %v6182_v47  ;;  %v794_v39 = vand.u32 4294901760, %v769_v7  ;;  %v8049_v62 = vand.u32 4294901760, %v7255_v34 }
  0x35   :  { %6245 = vmatpush3.bf16.msra.mxu0 %v7057_v37  ;;  %v6194_v40 = vpack.c.bf16 %v276_v30, %v269_v26  ;;  %v770_v26 = vld [vmem:[%s8033_s4 + $0x28] sm:$0xff]  ;;  %v885_v30 = vand.u32 4294901760, %v7237_v53  ;;  %v893_v51 = vsub.f32 %v7239_v55, %v892_v31 }
  0x36   :  { %6247 = vmatprep.subr.bf16.mxu0 %v7081_v48  ;;  %v797_v54 = vand.u32 4294901760, %v770_v26 }
  0x37   :  { %6185 = vmatpush3.bf16.msra.mxu1 %v6182_v47  ;;  %v767_v47 = vld [vmem:[%s8033_s4 + $0x10] sm:$0xff]  ;;  %v7266_v41 = vpack.c.bf16 %v892_v31, %v885_v30  ;;  %v886_v50 = vsub.f32 %v7237_v53, %v885_v30 }
  0x38   :  { %6187 = vmatprep.subr.bf16.mxu1 %v6186_v63  ;;  %v7282_v52 = vsub.f32 %v770_v26, %v797_v54  ;;  %v7299_v17 = vpack.c.bf16 %v797_v54, %v794_v39  ;;  %v6270_v54 = vpack.c.bf16 %v204_v24, %v197_v23 }
  0x39   :  { %6249 = vmatpush3.bf16.msra.mxu0 %v7081_v48 }
  0x3a   :  { %6251 = vmatprep.subr.bf16.mxu0 %v7105_v59  ;;  %v8052_v26 = vand.u32 4294901760, %v7282_v52 }
  0x3b   :  { %6189 = vmatpush3.bf16.msra.mxu1 %v6186_v63  ;;  %v788_v63 = vand.u32 4294901760, %v767_v47 }
  0x3c   :  { %6191 = vmatprep.subr.bf16.mxu1 %v6190_v10 }
  0x3d   :  { %6253 = vmatpush3.bf16.msra.mxu0 %v7105_v59 }
  0x3e   :  { %6255 = vmatprep.subr.bf16.mxu0 %v7122_v5 }
  0x3f   :  { %6193 = vmatpush3.bf16.msra.mxu1 %v6190_v10  ;;  %v7253_v10 = vsub.f32 %v767_v47, %v788_v63  ;;  %v7269_v47 = vpack.c.bf16 %v791_v0, %v788_v63  ;;  %v6266_v63 = vpack.c.bf16 %v190_v9, %v183_v8  ;;  %v800_v0 = vand.u32 4294901760, %v771_v15  ;;  %v774_v8 = vld [vmem:[%s8033_s4 + $0x48] sm:$0xff] }
  0x40   :  { %6195 = vmatprep.subr.bf16.mxu1 %v6194_v40 }
  0x41   :  { %6257 = vmatpush3.bf16.msra.mxu0 %v7122_v5  ;;  %v8050_v61 = vand.u32 4294901760, %v7253_v10 }
  0x42   :  { %6259 = vmatprep.subr.bf16.mxu0 %v7143_v21 }
  0x43   :  { %6197 = vmatpush3.bf16.msra.mxu1 %v6194_v40  ;;  %v7280_v40 = vsub.f32 %v769_v7, %v794_v39  ;;  %v7295_v7 = vpack.c.bf16 %v8049_v62, %v8050_v61  ;;  %v7310_v62 = vsub.f32 %v771_v15, %v800_v0  ;;  %v7312_v61 = vsub.f32 %v772_v16, %v803_v29 }
  0x44   :  { %6327 = vmatprep.subr.bf16.mxu1 %v7242_v6  ;;  %v806_v39 = vand.u32 4294901760, %v773_v19  ;;  %v7326_v15 = vpack.c.bf16 %v803_v29, %v800_v0  ;;  %v6274_v29 = vpack.c.bf16 %v218_v44, %v211_v36  ;;  %v812_v0 = vand.u32 4294901760, %v775_v20 }
  0x45   :  { %6261 = vmatpush3.bf16.msra.mxu0 %v7143_v21  ;;  %v8053_v9 = vand.u32 4294901760, %v7280_v40  ;;  %v8055_v23 = vand.u32 4294901760, %v7310_v62  ;;  %v8054_v24 = vand.u32 4294901760, %v7312_v61 }
  0x46   :  { %5351 = vmatmul.mubr.f32.vlgmr.msra.gmra.mrb[0].mxu1 %v7098_v57  ;;  %6263 = vmatprep.subr.bf16.mxu0 %v6262_v35  ;;  %v7336_v16 = vsub.f32 %v773_v19, %v806_v39 }
  0x47   :  { %6329 = vmatpush3.bf16.msra.mxu1 %v7242_v6  ;;  %5525 = vmatprep.mubr.f32.mxu1 %v7107_v60  ;;  %v7323_v27 = vpack.c.bf16 %v8052_v26, %v8053_v9  ;;  %v815_v9 = vand.u32 4294901760, %v776_v22 }
  0x48   :  { %5421 = vmatmul.mubr.f32.vlgmr.msra.gmra.mrb[0].mxu0 %v7140_v13  ;;  %6331 = vmatprep.subr.bf16.mxu1 %v7269_v47  ;;  %v8057_v36 = vand.u32 4294901760, %v7336_v16 }
  0x49   :  { %6265 = vmatpush3.bf16.msra.mxu0 %v6262_v35  ;;  %5455 = vmatprep.mubr.f32.mxu0 %v7059_v38  ;;  %v809_v35 = vand.u32 4294901760, %v774_v8 }
  0x4a   :  { %6267 = vmatprep.subr.bf16.mxu0 %v6266_v63 }
  0x4b   :  { %6333 = vmatpush3.bf16.msra.mxu1 %v7269_v47  ;;  %v7338_v26 = vsub.f32 %v774_v8, %v809_v35  ;;  %v7352_v19 = vpack.c.bf16 %v809_v35, %v806_v39  ;;  %v7362_v8 = vsub.f32 %v775_v20, %v812_v0  ;;  %v6278_v39 = vpack.c.bf16 %v232_v58, %v225_v56 }
  0x4c   :  { %6335 = vmatprep.subr.bf16.mxu1 %v7299_v17  ;;  %v818_v35 = vand.u32 4294901760, %v777_v32  ;;  %v7378_v20 = vpack.c.bf16 %v815_v9, %v812_v0  ;;  %v824_v0 = vand.u32 4294901760, %v779_v42 }
  0x4d   :  { %6269 = vmatpush3.bf16.msra.mxu0 %v6266_v63  ;;  %v7349_v63 = vpack.c.bf16 %v8054_v24, %v8055_v23  ;;  %v8056_v44 = vand.u32 4294901760, %v7338_v26  ;;  %v7364_v24 = vsub.f32 %v776_v22, %v815_v9  ;;  %v821_v23 = vand.u32 4294901760, %v778_v33 }
  0x4e   :  { %6271 = vmatprep.subr.bf16.mxu0 %v6270_v54  ;;  %v8059_v56 = vand.u32 4294901760, %v7362_v8  ;;  %v7388_v22 = vsub.f32 %v777_v32, %v818_v35  ;;  %v6282_v9 = vpack.c.bf16 %v246_v25, %v239_v3 }
  0x4f   :  { %6337 = vmatpush3.bf16.msra.mxu1 %v7299_v17  ;;  %v8058_v58 = vand.u32 4294901760, %v7364_v24  ;;  %v7404_v32 = vpack.c.bf16 %v821_v23, %v818_v35  ;;  %v8069_v35 = vand.u32 4294901760, %v7115_v2 }
  0x50   :  { %6339 = vmatprep.subr.bf16.mxu1 %v7326_v15  ;;  %v969_v3 = vand.u32 4294901760, %v7388_v22 }
  0x51   :  { %6273 = vmatpush3.bf16.msra.mxu0 %v6270_v54  ;;  %v7375_v54 = vpack.c.bf16 %v8056_v44, %v8057_v36  ;;  %v7390_v44 = vsub.f32 %v778_v33, %v821_v23  ;;  %v827_v36 = vand.u32 4294901760, %v780_v43  ;;  %v7414_v33 = vsub.f32 %v779_v42, %v824_v0 }
  0x52   :  { %6275 = vmatprep.subr.bf16.mxu0 %v6274_v29  ;;  %v8068_v23 = vand.u32 4294901760, %v7113_v1  ;;  %v894_v42 = vand.u32 4294901760, %v893_v51  ;;  %v8072_v1 = vand.u32 4294901760, %v7255_v34  ;;  %v8075_v51 = vand.u32 4294901760, %v7280_v40 }
  0x53   :  { %6341 = vmatpush3.bf16.msra.mxu1 %v7326_v15  ;;  %v8061_v25 = vand.u32 4294901760, %v7390_v44  ;;  %v7423_v30 = vpack.c.bf16 %v827_v36, %v824_v0 }
  0x54   :  { %6343 = vmatprep.subr.bf16.mxu1 %v7352_v19  ;;  %v907_v2 = vsub.f32 %v7255_v34, %v8072_v1 }
  0x55   :  { %6277 = vmatpush3.bf16.msra.mxu0 %v6274_v29  ;;  %v7401_v29 = vpack.c.bf16 %v8058_v58, %v8059_v56  ;;  %v7416_v58 = vsub.f32 %v780_v43, %v827_v36  ;;  %v6286_v56 = vpack.c.bf16 %v8069_v35, %v8068_v23  ;;  %v7427_v31 = vpack.c.bf16 %v8061_v25, %v969_v3 }
  0x56   :  { %6279 = vmatprep.subr.bf16.mxu0 %v6278_v39  ;;  %v8071_v43 = vand.u32 4294901760, %v7253_v10  ;;  %v983_v36 = vand.u32 4294901760, %v7414_v33  ;;  %v8073_v23 = vand.u32 4294901760, %v7135_v11  ;;  %v8074_v35 = vand.u32 4294901760, %v7137_v12 }
  0x57   :  { %6345 = vmatpush3.bf16.msra.mxu1 %v7352_v19  ;;  %8067 = vst [vmem:[#allocation3_spill] sm:$0xff] %v7401_v29  ;;  %8070 = vst [vmem:[#allocation4_spill] sm:$0xff] %v7427_v31  ;;  %v990_v0 = vand.u32 4294901760, %v7416_v58  ;;  %v908_v31 = vand.u32 4294901760, %v907_v2  ;;  %v8076_v29 = vand.u32 4294901760, %v7282_v52  ;;  %v8077_v12 = vand.u32 4294901760, %v7310_v62 }
  0x58   :  { %6347 = vmatprep.subr.bf16.mxu1 %v7378_v20  ;;  %v900_v60 = vsub.f32 %v7253_v10, %v8071_v43  ;;  %v914_v43 = vsub.f32 %v7280_v40, %v8075_v51 }
  0x59   :  { %6281 = vmatpush3.bf16.msra.mxu0 %v6278_v39  ;;  %v887_v39 = vand.u32 4294901760, %v886_v50  ;;  %v6290_v50 = vpack.c.bf16 %v8074_v35, %v8073_v23  ;;  %v7446_v25 = vpack.c.bf16 %v990_v0, %v983_v36  ;;  %v921_v11 = vsub.f32 %v7282_v52, %v8076_v29 }
  0x5a   :  { %6283 = vmatprep.subr.bf16.mxu0 %v6282_v9  ;;  %v901_v1 = vand.u32 4294901760, %v900_v60  ;;  %v928_v23 = vsub.f32 %v7310_v62, %v8077_v12  ;;  %v8078_v35 = vand.u32 4294901760, %v7312_v61  ;;  %v915_v60 = vand.u32 4294901760, %v914_v43 }
  0x5b   :  { %6349 = vmatpush3.bf16.msra.mxu1 %v7378_v20  ;;  %v8079_v12 = vand.u32 4294901760, %v7336_v16  ;;  %v8080_v43 = vand.u32 4294901760, %v7338_v26 }
  0x5c   :  { %6351 = vmatprep.subr.bf16.mxu1 %v7404_v32  ;;  %v935_v51 = vsub.f32 %v7312_v61, %v8078_v35 }
  0x5d   :  { %6285 = vmatpush3.bf16.msra.mxu0 %v6282_v9  ;;  %v6358_v9 = vpack.c.bf16 %v894_v42, %v887_v39  ;;  %v6362_v39 = vpack.c.bf16 %v908_v31, %v901_v1  ;;  %v922_v42 = vand.u32 4294901760, %v921_v11  ;;  %v942_v31 = vsub.f32 %v7336_v16, %v8079_v12 }
  0x5e   :  { %6287 = vmatprep.subr.bf16.mxu0 %v6286_v56  ;;  %v936_v29 = vand.u32 4294901760, %v935_v51  ;;  %v8082_v51 = vand.u32 4294901760, %v7364_v24 }
  0x5f   :  { %6353 = vmatpush3.bf16.msra.mxu1 %v7404_v32  ;;  %v6366_v2 = vpack.c.bf16 %v922_v42, %v915_v60  ;;  %v943_v1 = vand.u32 4294901760, %v942_v31 }
  0x60   :  { %6355 = vmatprep.subr.bf16.mxu1 %v7423_v30  ;;  %v963_v60 = vsub.f32 %v7364_v24, %v8082_v51 }
  0x61   :  { %6289 = vmatpush3.bf16.msra.mxu0 %v6286_v56  ;;  %v929_v56 = vand.u32 4294901760, %v928_v23  ;;  %v8081_v23 = vand.u32 4294901760, %v7362_v8 }
  0x62   :  { %6291 = vmatprep.subr.bf16.mxu0 %v6290_v50 }
  0x63   :  { %6357 = vmatpush3.bf16.msra.mxu1 %v7423_v30  ;;  %v956_v35 = vsub.f32 %v7362_v8, %v8081_v23 }
  0x64   :  { %6359 = vmatprep.subr.bf16.mxu1 %v6358_v9 }
  0x65   :  { %6293 = vmatpush3.bf16.msra.mxu0 %v6290_v50  ;;  %v949_v50 = vsub.f32 %v7338_v26, %v8080_v43  ;;  %v957_v42 = vand.u32 4294901760, %v956_v35 }
  0x66   :  { %5526 = vmatmul.mubr.f32.vlgmr.msra.gmra.mrb[2].mxu1 %v7168_v46  ;;  %6295 = vmatprep.subr.bf16.mxu0 %v7009_v14 }
  0x67   :  { %6361 = vmatpush3.bf16.msra.mxu1 %v6358_v9  ;;  %5560 = vmatprep.mubr.f32.mxu1 %v7059_v38  ;;  %v6370_v9 = vpack.c.bf16 %v936_v29, %v929_v56  ;;  %v950_v11 = vand.u32 4294901760, %v949_v50  ;;  %v964_v56 = vand.u32 4294901760, %v963_v60  ;;  %v8083_v29 = vand.u32 4294901760, %v7390_v44  ;;  %v749_v60 = vld [vmem:[%s8035_s3] sm:$0xff] }
  0x68   :  { %5456 = vmatmul.mubr.f32.vlgmr.msra.gmra.mrb[0].mxu0 %v7098_v57  ;;  %6363 = vmatprep.subr.bf16.mxu1 %v6362_v39 }
  0x69   :  { %6297 = vmatpush3.bf16.msra.mxu0 %v7009_v14  ;;  %5490 = vmatprep.mubr.f32.mxu0 %v7059_v38  ;;  %v970_v14 = vsub.f32 %v7388_v22, %v969_v3  ;;  %v977_v12 = vsub.f32 %v7390_v44, %v8083_v29  ;;  %v991_v3 = vsub.f32 %v7416_v58, %v990_v0  ;;  %v751_v29 = vld [vmem:[%s8035_s3 + $0x10] sm:$0xff] }
  0x6a   :  { %6299 = vmatprep.subr.bf16.mxu0 %v7017_v18 }
  0x6b   :  { %6365 = vmatpush3.bf16.msra.mxu1 %v6362_v39  ;;  %v6374_v39 = vpack.c.bf16 %v950_v11, %v943_v1  ;;  %v971_v31 = vand.u32 4294901760, %v970_v14  ;;  %v978_v43 = vand.u32 4294901760, %v977_v12  ;;  %v750_v14 = vld [vmem:[%s8035_s3 + $0x8] sm:$0xff]  ;;  %v752_v12 = vld [vmem:[%s8035_s3 + $0x18] sm:$0xff] }
  0x6c   :  { %6367 = vmatprep.subr.bf16.mxu1 %v6366_v2 }
  0x6d   :  { %6301 = vmatpush3.bf16.msra.mxu0 %v7017_v18  ;;  %v6378_v18 = vpack.c.bf16 %v964_v56, %v957_v42  ;;  %v6382_v50 = vpack.c.bf16 %v978_v43, %v971_v31  ;;  %v1984_v42 = vand.u32 4294901760, %v750_v14  ;;  %v1987_v31 = vand.u32 4294901760, %v751_v29  ;;  %v753_v43 = vld [vmem:[%s8035_s3 + $0x20] sm:$0xff] }
  0x6e   :  { %6303 = vmatprep.subr.bf16.mxu0 %v7038_v28 }
  0x6f   :  { %6369 = vmatpush3.bf16.msra.mxu1 %v6366_v2  ;;  %v984_v2 = vsub.f32 %v7414_v33, %v983_v36 }
  0x70   :  { %6371 = vmatprep.subr.bf16.mxu1 %v6370_v9 }
  0x71   :  { %6305 = vmatpush3.bf16.msra.mxu0 %v7038_v28  ;;  %v985_v1 = vand.u32 4294901760, %v984_v2  ;;  %v992_v28 = vand.u32 4294901760, %v991_v3  ;;  %v754_v2 = vld [vmem:[%s8035_s3 + $0x28] sm:$0xff] }
  0x72   :  { %6307 = vmatprep.subr.bf16.mxu0 %v7057_v37 }
  0x73   :  { %6373 = vmatpush3.bf16.msra.mxu1 %v6370_v9  ;;  %v6386_v9 = vpack.c.bf16 %v992_v28, %v985_v1  ;;  %v1996_v1 = vand.u32 4294901760, %v754_v2  ;;  %v755_v28 = vld [vmem:[%s8035_s3 + $0x30] sm:$0xff] }
  0x74   :  { %6375 = vmatprep.subr.bf16.mxu1 %v6374_v39 }
  0x75   :  { %6309 = vmatpush3.bf16.msra.mxu0 %v7057_v37  ;;  %v6390_v37 = vpack.c.bf16 %v7239_v55, %v7237_v53  ;;  %v6410_v53 = vpack.c.bf16 %v7364_v24, %v7362_v8  ;;  %v6414_v55 = vpack.c.bf16 %v7390_v44, %v7388_v22  ;;  %v1466_v22 = vld [vmem:[%s8034_s5 + $0x8] sm:$0xf] }
  0x76   :  { %6311 = vmatprep.subr.bf16.mxu0 %v7081_v48 }
  0x77   :  { %6377 = vmatpush3.bf16.msra.mxu1 %v6374_v39  ;;  %v1981_v39 = vand.u32 4294901760, %v749_v60 }
  0x78   :  { %6379 = vmatprep.subr.bf16.mxu1 %v6378_v18 }
  0x79   :  { %6313 = vmatpush3.bf16.msra.mxu0 %v7081_v48  ;;  %v6394_v48 = vpack.c.bf16 %v7255_v34, %v7253_v10  ;;  %v6418_v10 = vpack.c.bf16 %v7416_v58, %v7414_v33  ;;  %v8084_v34 = vld [vmem:[#allocation3_spill] sm:$0xff]  ;;  %v7603_v56 = vpack.c.bf16 %v1984_v42, %v1981_v39 }
  0x7a   :  { %6315 = vmatprep.subr.bf16.mxu0 %v7105_v59 }
  0x7b   :  { %6381 = vmatpush3.bf16.msra.mxu1 %v6378_v18  ;;  %v1990_v18 = vand.u32 4294901760, %v752_v12 }
  0x7c   :  { %6383 = vmatprep.subr.bf16.mxu1 %v6382_v50 }
  0x7d   :  { %6317 = vmatpush3.bf16.msra.mxu0 %v7105_v59  ;;  %v6398_v59 = vpack.c.bf16 %v7282_v52, %v7280_v40  ;;  %v7619_v3 = vpack.c.bf16 %v1990_v18, %v1987_v31 }
  0x7e   :  { %6319 = vmatprep.subr.bf16.mxu0 %v7122_v5 }
  0x7f   :  { %6385 = vmatpush3.bf16.msra.mxu1 %v6382_v50  ;;  %v1993_v50 = vand.u32 4294901760, %v753_v43 }
  0x80   :  { %6387 = vmatprep.subr.bf16.mxu1 %v6386_v9 }
  0x81   :  { %6321 = vmatpush3.bf16.msra.mxu0 %v7122_v5  ;;  %v6402_v5 = vpack.c.bf16 %v7312_v61, %v7310_v62 }
  0x82   :  { %6323 = vmatprep.subr.bf16.mxu0 %v7143_v21 }
  0x83   :  { %6389 = vmatpush3.bf16.msra.mxu1 %v6386_v9  ;;  %v756_v9 = vld [vmem:[%s8035_s3 + $0x38] sm:$0xff] }
  0x84   :  { %6391 = vmatprep.subr.bf16.mxu1 %v6390_v37 }
  0x85   :  { %6325 = vmatpush3.bf16.msra.mxu0 %v7143_v21  ;;  %v6406_v21 = vpack.c.bf16 %v7338_v26, %v7336_v16 }
  0x86   :  { %5561 = vmatmul.mubr.f32.vlgmr.msra.gmra.mrb[2].mxu1 %v7098_v57 }
  0x87   :  { %6393 = vmatpush3.bf16.msra.mxu1 %v6390_v37  ;;  %5595 = vmatprep.mubr.f32.mxu1 %v7071_v45  ;;  %v8086_v37 = vld [vmem:[#allocation2_spill] sm:$0xff] }
  0x88   :  { %5491 = vmatmul.mubr.f32.vlgmr.msra.gmra.mrb[0].mxu0 %v7098_v57  ;;  %6395 = vmatprep.subr.bf16.mxu1 %v6394_v48 }
  0x8b   :  { %6397 = vmatpush3.bf16.msra.mxu1 %v6394_v48  ;;  %v7630_v48 = vpack.c.bf16 %v1996_v1, %v1993_v50 }
  0x8c   :  { %6399 = vmatprep.subr.bf16.mxu1 %v6398_v59 }
  0x8f   :  { %6401 = vmatpush3.bf16.msra.mxu1 %v6398_v59  ;;  %v1999_v59 = vand.u32 4294901760, %v755_v28 }
  0x90   :  { %6403 = vmatprep.subr.bf16.mxu1 %v6402_v5 }
  0x93   :  { %6405 = vmatpush3.bf16.msra.mxu1 %v6402_v5  ;;  %v2002_v5 = vand.u32 4294901760, %v756_v9 }
  0x94   :  { %6407 = vmatprep.subr.bf16.mxu1 %v6406_v21 }
  0x97   :  { %6409 = vmatpush3.bf16.msra.mxu1 %v6406_v21  ;;  %v757_v21 = vld [vmem:[%s8035_s3 + $0x40] sm:$0xff] }
  0x98   :  { %6411 = vmatprep.subr.bf16.mxu1 %v6410_v53 }
  0x9b   :  { %6413 = vmatpush3.bf16.msra.mxu1 %v6410_v53  ;;  %v758_v53 = vld [vmem:[%s8035_s3 + $0x48] sm:$0xff] }
  0x9c   :  { %6415 = vmatprep.subr.bf16.mxu1 %v6414_v55 }
  0x9f   :  { %6417 = vmatpush3.bf16.msra.mxu1 %v6414_v55  ;;  %v7640_v55 = vpack.c.bf16 %v2002_v5, %v1999_v59 }
  0xa0   :  { %6419 = vmatprep.subr.bf16.mxu1 %v6418_v10 }
  0xa3   :  { %6421 = vmatpush3.bf16.msra.mxu1 %v6418_v10  ;;  %v2005_v10 = vand.u32 4294901760, %v757_v21 }
  0xa4   :  { %6423 = vmatprep.subr.bf16.mxu1 %v7242_v6 }
  0xa6   :  { %5596 = vmatmul.mubr.f32.vlgmr.msra.gmra.mrb[2].mxu1 %v7119_v4 }
  0xa7   :  { %6425 = vmatpush3.bf16.msra.mxu1 %v7242_v6  ;;  %5630 = vmatprep.mubr.f32.mxu1 %v7084_v49 }
  0xa8   :  { %6427 = vmatprep.subr.bf16.mxu1 %v7269_v47 }
  0xab   :  { %6429 = vmatpush3.bf16.msra.mxu1 %v7269_v47 }
  0xac   :  { %6431 = vmatprep.subr.bf16.mxu1 %v7299_v17 }
  0xaf   :  { %6433 = vmatpush3.bf16.msra.mxu1 %v7299_v17 }
  0xb0   :  { %6435 = vmatprep.subr.bf16.mxu1 %v7326_v15 }
  0xb3   :  { %6437 = vmatpush3.bf16.msra.mxu1 %v7326_v15 }
  0xb4   :  { %6439 = vmatprep.subr.bf16.mxu1 %v7352_v19 }
  0xb7   :  { %6441 = vmatpush3.bf16.msra.mxu1 %v7352_v19 }
  0xb8   :  { %6443 = vmatprep.subr.bf16.mxu1 %v7378_v20 }
  0xbb   :  { %6445 = vmatpush3.bf16.msra.mxu1 %v7378_v20 }
  0xbc   :  { %6447 = vmatprep.subr.bf16.mxu1 %v7404_v32 }
  0xbf   :  { %6449 = vmatpush3.bf16.msra.mxu1 %v7404_v32 }
  0xc0   :  { %6451 = vmatprep.subr.bf16.mxu1 %v7423_v30 }
  0xc3   :  { %6453 = vmatpush3.bf16.msra.mxu1 %v7423_v30 }
  0xc4   :  { %6455 = vmatprep.subr.bf16.mxu1 %v7266_v41 }
  0xc6   :  { %5631 = vmatmul.mubr.f32.vlgmr.msra.gmra.mrb[2].mxu1 %v7140_v13 }
  0xc7   :  { %6457 = vmatpush3.bf16.msra.mxu1 %v7266_v41  ;;  %5665 = vmatprep.mubr.f32.mxu1 %v7059_v38  ;;  %v8085_v41 = vld [vmem:[#allocation4_spill] sm:$0xff] }
  0xc8   :  { %6459 = vmatprep.subr.bf16.mxu1 %v7295_v7 }
  0xcb   :  { %6461 = vmatpush3.bf16.msra.mxu1 %v7295_v7 }
  0xcc   :  { %6463 = vmatprep.subr.bf16.mxu1 %v7323_v27 }
  0xcf   :  { %6465 = vmatpush3.bf16.msra.mxu1 %v7323_v27  ;;  %v1465_v27 = vld [vmem:[%s8034_s5] sm:$0xff] }
  0xd0   :  { %6467 = vmatprep.subr.bf16.mxu1 %v7349_v63  ;;  %v1469_v61 = vsel %vm1467_vm0, %v1465_v27, 0  ;;  %v760_v27 = vld [vmem:[%s8035_s3 + $0x58] sm:$0xff] }
  0xd1   :  { %v7563_v62 = vand.u32 4294901760, %v1469_v61 }
  0xd3   :  { %6469 = vmatpush3.bf16.msra.mxu1 %v7349_v63  ;;  %5714 = vmatprep.mubr.f32.mxu0 %v7563_v62  ;;  %v7584_v11 = vsub.f32 %v1469_v61, %v7563_v62  ;;  %v7652_v61 = vld [vmem:[%s8035_s3 + $0x60] sm:$0xff] }
  0xd4   :  { %6471 = vmatprep.subr.bf16.mxu1 %v7375_v54 }
  0xd5   :  { %v1547_v35 = vand.u32 4294901760, %v7584_v11 }
  0xd7   :  { %6473 = vmatpush3.bf16.msra.mxu1 %v7375_v54 }
  0xd8   :  { %6475 = vmatprep.subr.bf16.mxu1 %v8084_v34 }
  0xdb   :  { %6477 = vmatpush3.bf16.msra.mxu1 %v8084_v34  ;;  %v2008_v34 = vand.u32 4294901760, %v758_v53 }
  0xdc   :  { %6479 = vmatprep.subr.bf16.mxu1 %v8085_v41 }
  0xdf   :  { %6481 = vmatpush3.bf16.msra.mxu1 %v8085_v41  ;;  %v759_v41 = vld [vmem:[%s8035_s3 + $0x50] sm:$0xff] }
  0xe0   :  { %6483 = vmatprep.subr.bf16.mxu1 %v7446_v25 }
  0xe3   :  { %6485 = vmatpush3.bf16.msra.mxu1 %v7446_v25 }
  0xe4   :  { %6487 = vmatprep.subr.bf16.mxu1 %v7242_v6 }
  0xe6   :  { %5666 = vmatmul.mubr.f32.vlgmr.msra.gmra.mrb[2].mxu1 %v7098_v57 }
  0xe7   :  { %6489 = vmatpush3.bf16.msra.mxu1 %v7242_v6  ;;  %5700 = vmatprep.mubr.f32.mxu1 %v7059_v38 }
  0xe8   :  { %6491 = vmatprep.subr.bf16.mxu1 %v7269_v47 }
  0xeb   :  { %6493 = vmatpush3.bf16.msra.mxu1 %v7269_v47 }
  0xec   :  { %6495 = vmatprep.subr.bf16.mxu1 %v7299_v17 }
  0xef   :  { %6497 = vmatpush3.bf16.msra.mxu1 %v7299_v17 }
  0xf0   :  { %6499 = vmatprep.subr.bf16.mxu1 %v7326_v15 }
  0xf3   :  { %6501 = vmatpush3.bf16.msra.mxu1 %v7326_v15 }
  0xf4   :  { %6503 = vmatprep.subr.bf16.mxu1 %v7352_v19 }
  0xf7   :  { %6505 = vmatpush3.bf16.msra.mxu1 %v7352_v19 }
  0xf8   :  { %6507 = vmatprep.subr.bf16.mxu1 %v7378_v20 }
  0xfb   :  { %6509 = vmatpush3.bf16.msra.mxu1 %v7378_v20 }
  0xfc   :  { %6511 = vmatprep.subr.bf16.mxu1 %v7404_v32 }
  0xff   :  { %6513 = vmatpush3.bf16.msra.mxu1 %v7404_v32 }
 0x100   :  { %6515 = vmatprep.subr.bf16.mxu1 %v7423_v30 }
 0x103   :  { %6517 = vmatpush3.bf16.msra.mxu1 %v7423_v30  ;;  %v1472_v30 = vsel %vm1467_vm0, %v1466_v22, 0 }
 0x104   :  { %v1555_v0 = vand.u32 4294901760, %v1472_v30 }
 0x106   :  { %5701 = vmatmul.mubr.f32.vlgmr.msra.gmra.mrb[2].mxu1 %v7098_v57  ;;  %v7587_v23 = vsub.f32 %v1472_v30, %v1555_v0  ;;  %v7706_v30 = vsub.f32 %v753_v43, %v1993_v50 }
 0x108   :  { %v1557_v51 = vand.u32 4294901760, %v7587_v23 }
 0x119   :  { %v5352_v6 = vpop.f32.mrb[0].mxu1 }
 0x11a   :  { %v313_v47 = vpop.f32.mrb[1].mxu1 }
 0x15b   :  { %v5492_v40 = vpop.f32.mrb[0].mxu0 }
 0x15c   :  { %v6814_v52 = vadd.f32 %v5492_v40, %v5352_v6  ;;  %v739_v7 = vpop.f32.mrb[1].mxu0  ;;  %v7659_v6 = vsub.f32 %v749_v60, %v1981_v39  ;;  %v7664_v40 = vpack.c.bf16 %v2008_v34, %v2005_v10  ;;  %v7712_v60 = vsub.f32 %v756_v9, %v2002_v5 }
 0x15d   :  { %v6815_v17 = vadd.f32 %v739_v7, %v313_v47  ;;  %v7661_v47 = vsub.f32 %v750_v14, %v1984_v42  ;;  %v2014_v7 = vand.u32 4294901760, %v760_v27 }
 0x15e   :  { %v1476_v26 = vsel %vm1474_vm1, %v6814_v52, 0  ;;  %v2011_v52 = vand.u32 4294901760, %v759_v41 }
 0x15f   :  { %v1482_v15 = vand.u32 4294901760, %v1476_v26  ;;  %v1479_v24 = vand.u32 4294901760, %v6815_v17 }
 0x161   :  { %v1574_v16 = vsub.f32 %v1476_v26, %v1482_v15  ;;  %v6518_v63 = vpack.c.bf16 %v1482_v15, %v1479_v24  ;;  %v1567_v19 = vsub.f32 %v6815_v17, %v1479_v24  ;;  %v2017_v17 = vand.u32 4294901760, %v7652_v61 }
 0x162   :  { %v2084_v15 = vand.u32 4294901760, %v7659_v6  ;;  %v2091_v24 = vand.u32 4294901760, %v7661_v47 }
 0x163   :  { %v1575_v44 = vand.u32 4294901760, %v1574_v16  ;;  %v1568_v8 = vand.u32 4294901760, %v1567_v19  ;;  %6519 = vmatprep.subr.bf16.mxu1 %v6518_v63  ;;  %v6526_v54 = vpack.c.bf16 %v1574_v16, %v1567_v19 }
 0x164   :  { %6521 = vmatpush3.bf16.msra.mxu1 %v6518_v63  ;;  %v2085_v22 = vsub.f32 %v7659_v6, %v2084_v15 }
 0x165   :  { %v1569_v20 = vsub.f32 %v1567_v19, %v1568_v8  ;;  %v1576_v58 = vsub.f32 %v1574_v16, %v1575_v44  ;;  %v6534_v32 = vpack.c.bf16 %v1575_v44, %v1568_v8  ;;  %v7672_v16 = vpack.c.bf16 %v2014_v7, %v2011_v52  ;;  %v7682_v19 = vld [vmem:[%s8035_s3 + $0x78] sm:$0xff] }
 0x166   :  { %v7684_v44 = vsub.f32 %v751_v29, %v1987_v31  ;;  %v7686_v8 = vsub.f32 %v752_v12, %v1990_v18  ;;  %v2086_v39 = vand.u32 4294901760, %v2085_v22  ;;  %v2112_v31 = vand.u32 4294901760, %v7706_v30 }
 0x167   :  { %v1570_v25 = vand.u32 4294901760, %v1569_v20  ;;  %v1577_v33 = vand.u32 4294901760, %v1576_v58  ;;  %v2026_v58 = vand.u32 4294901760, %v7682_v19 }
 0x169   :  { %v6522_v36 = vpack.c.bf16 %v1577_v33, %v1570_v25  ;;  %v2098_v25 = vand.u32 4294901760, %v7684_v44  ;;  %v2105_v33 = vand.u32 4294901760, %v7686_v8 }
 0x16b   :  { %6523 = vmatprep.subr.bf16.mxu0 %v6522_v36  ;;  %v2099_v29 = vsub.f32 %v7684_v44, %v2098_v25  ;;  %v2106_v12 = vsub.f32 %v7686_v8, %v2105_v33 }
 0x16c   :  { %6525 = vmatpush3.bf16.msra.mxu0 %v6522_v36  ;;  %v7708_v36 = vsub.f32 %v754_v2, %v1996_v1  ;;  %v8065_v2 = vand.u32 4294901760, %v7712_v60  ;;  %v7733_v1 = vsub.f32 %v757_v21, %v2005_v10 }
 0x16d   :  { %6527 = vmatprep.subr.bf16.mxu0 %v6526_v54  ;;  %v2100_v9 = vand.u32 4294901760, %v2099_v29 }
 0x16e   :  { %v2119_v18 = vand.u32 4294901760, %v7708_v36  ;;  %v2134_v21 = vsub.f32 %v7712_v60, %v8065_v2 }
 0x16f   :  { %5715 = vmatmul.mubr.f32.vlgmr.msra.gmra.mrb[2].mxu0 %v1555_v0 }
 0x170   :  { %6529 = vmatpush3.bf16.msra.mxu0 %v6526_v54  ;;  %5721 = vmatprep.mubr.f32.mxu0 %v7584_v11  ;;  %v2120_v5 = vsub.f32 %v7708_v36, %v2119_v18 }
 0x171   :  { %6531 = vmatprep.subr.bf16.mxu0 %v6518_v63 }
 0x172   :  { %v2121_v29 = vand.u32 4294901760, %v2120_v5 }
 0x177   :  { %5722 = vmatmul.mubr.f32.vlgmr.msra.gmra.mrb[2].mxu0 %v7587_v23 }
 0x178   :  { %6533 = vmatpush3.bf16.msra.mxu0 %v6518_v63  ;;  %5728 = vmatprep.mubr.f32.mxu0 %v1547_v35 }
 0x179   :  { %6535 = vmatprep.subr.bf16.mxu0 %v6534_v32 }
 0x17f   :  { %5729 = vmatmul.mubr.f32.vlgmr.msra.gmra.mrb[2].mxu0 %v1557_v51 }
 0x180   :  { %6537 = vmatpush3.bf16.msra.mxu0 %v6534_v32  ;;  %5735 = vmatprep.mubr.f32.mxu0 %v7563_v62  ;;  %v2092_v32 = vsub.f32 %v7661_v47, %v2091_v24 }
 0x181   :  { %6539 = vmatprep.subr.bf16.mxu0 %v6518_v63 }
 0x182   :  { %v2093_v42 = vand.u32 4294901760, %v2092_v32  ;;  %v7755_v32 = vsub.f32 %v760_v27, %v2014_v7 }
 0x184   :  { %v6574_v50 = vpack.c.bf16 %v2093_v42, %v2086_v39 }
 0x187   :  { %5736 = vmatmul.mubr.f32.vlgmr.msra.gmra.mrb[2].mxu0 %v1555_v0 }
 0x188   :  { %6541 = vmatpush3.bf16.msra.mxu0 %v6518_v63  ;;  %5742 = vmatprep.mubr.f32.mxu0 %v7563_v62  ;;  %v7657_v62 = vld [vmem:[%s8035_s3 + $0x68] sm:$0xff]  ;;  %v7677_v63 = vld [vmem:[%s8035_s3 + $0x70] sm:$0xff] }
 0x189   :  { %6543 = vmatprep.subr.bf16.mxu0 %v7603_v56  ;;  %v2020_v26 = vand.u32 4294901760, %v7657_v62  ;;  %v2023_v20 = vand.u32 4294901760, %v7677_v63 }
 0x18b   :  { %v7692_v54 = vpack.c.bf16 %v2020_v26, %v2017_v17  ;;  %v7719_v14 = vpack.c.bf16 %v2026_v58, %v2023_v20 }
 0x18f   :  { %5743 = vmatmul.mubr.f32.vlgmr.msra.gmra.mrb[2].mxu0 %v1555_v0  ;;  %v7710_v0 = vsub.f32 %v755_v28, %v1999_v59  ;;  %v7735_v28 = vsub.f32 %v758_v53, %v2008_v34  ;;  %v2113_v59 = vsub.f32 %v7706_v30, %v2112_v31  ;;  %v2140_v53 = vand.u32 4294901760, %v7733_v1 }
 0x190   :  { %6545 = vmatpush3.bf16.msra.mxu0 %v7603_v56  ;;  %5777 = vmatprep.mubr.f32.mxu0 %v8086_v37  ;;  %v2107_v37 = vand.u32 4294901760, %v2106_v12  ;;  %v7753_v34 = vsub.f32 %v759_v41, %v2011_v52  ;;  %v2161_v52 = vand.u32 4294901760, %v7755_v32 }
 0x191   :  { %6547 = vmatprep.subr.bf16.mxu0 %v7619_v3  ;;  %v8064_v43 = vand.u32 4294901760, %v7710_v0  ;;  %v2147_v10 = vand.u32 4294901760, %v7735_v28  ;;  %v2114_v42 = vand.u32 4294901760, %v2113_v59  ;;  %v2141_v2 = vsub.f32 %v7733_v1, %v2140_v53 }
 0x192   :  { %v6578_v39 = vpack.c.bf16 %v2107_v37, %v2100_v9  ;;  %v2154_v27 = vand.u32 4294901760, %v7753_v34 }
 0x193   :  { %v2127_v22 = vsub.f32 %v7710_v0, %v8064_v43  ;;  %v2135_v43 = vand.u32 4294901760, %v2134_v21  ;;  %v2148_v41 = vsub.f32 %v7735_v28, %v2147_v10  ;;  %v6582_v7 = vpack.c.bf16 %v2121_v29, %v2114_v42 }
 0x194   :  { %6549 = vmatpush3.bf16.msra.mxu0 %v7619_v3  ;;  %v2142_v37 = vand.u32 4294901760, %v2141_v2  ;;  %v2155_v5 = vsub.f32 %v7753_v34, %v2154_v27 }
 0x195   :  { %6551 = vmatprep.subr.bf16.mxu0 %v7630_v48  ;;  %v2128_v12 = vand.u32 4294901760, %v2127_v22  ;;  %v2149_v59 = vand.u32 4294901760, %v2148_v41  ;;  %v2162_v22 = vsub.f32 %v7755_v32, %v2161_v52 }
 0x196   :  { %v2156_v2 = vand.u32 4294901760, %v2155_v5  ;;  %v6606_v5 = vpack.c.bf16 %v7661_v47, %v7659_v6  ;;  %v6674_v6 = vpack.c.bf16 %v2105_v33, %v2098_v25  ;;  %v3201_v25 = vld [vmem:[%s8036_s8 + $0x68] sm:$0xff]  ;;  %v8087_v33 = vand.u32 4294901760, %v7710_v0 }
 0x197   :  { %v6586_v9 = vpack.c.bf16 %v2135_v43, %v2128_v12  ;;  %v6590_v43 = vpack.c.bf16 %v2149_v59, %v2142_v37  ;;  %v2163_v21 = vand.u32 4294901760, %v2162_v22  ;;  %v6610_v22 = vpack.c.bf16 %v7686_v8, %v7684_v44  ;;  %v3200_v8 = vld [vmem:[%s8036_s8 + $0x60] sm:$0xff] }
 0x198   :  { %6553 = vmatpush3.bf16.msra.mxu0 %v7630_v48  ;;  %v6678_v44 = vpack.c.bf16 %v2119_v18, %v2112_v31  ;;  %v6686_v31 = vpack.c.bf16 %v2147_v10, %v2140_v53 }
 0x199   :  { %6555 = vmatprep.subr.bf16.mxu0 %v7640_v55 }
 0x19c   :  { %6557 = vmatpush3.bf16.msra.mxu0 %v7640_v55 }
 0x19d   :  { %6559 = vmatprep.subr.bf16.mxu0 %v7664_v40 }
 0x1a0   :  { %6561 = vmatpush3.bf16.msra.mxu0 %v7664_v40 }
 0x1a1   :  { %6563 = vmatprep.subr.bf16.mxu0 %v7672_v16 }
 0x1a4   :  { %6565 = vmatpush3.bf16.msra.mxu0 %v7672_v16 }
 0x1a5   :  { %6567 = vmatprep.subr.bf16.mxu0 %v7692_v54 }
 0x1a8   :  { %6569 = vmatpush3.bf16.msra.mxu0 %v7692_v54 }
 0x1a9   :  { %6571 = vmatprep.subr.bf16.mxu0 %v7719_v14 }
 0x1ac   :  { %6573 = vmatpush3.bf16.msra.mxu0 %v7719_v14 }
 0x1ad   :  { %6575 = vmatprep.subr.bf16.mxu0 %v6574_v50 }
 0x1af   :  { %5778 = vmatmul.mubr.f32.vlgmr.msra.gmra.mrb[2].mxu0 %v7168_v46  ;;  %v7770_v46 = vsub.f32 %v7652_v61, %v2017_v17 }
 0x1b0   :  { %6577 = vmatpush3.bf16.msra.mxu0 %v6574_v50  ;;  %5812 = vmatprep.mubr.f32.mxu0 %v7059_v38  ;;  %v7775_v50 = vsub.f32 %v7657_v62, %v2020_v26  ;;  %v7788_v62 = vsub.f32 %v7677_v63, %v2023_v20  ;;  %v7793_v26 = vsub.f32 %v7682_v19, %v2026_v58 }
 0x1b1   :  { %6579 = vmatprep.subr.bf16.mxu0 %v6578_v39  ;;  %v2168_v61 = vand.u32 4294901760, %v7770_v46  ;;  %v6594_v19 = vpack.c.bf16 %v2163_v21, %v2156_v2  ;;  %v6618_v2 = vpack.c.bf16 %v7712_v60, %v7710_v0  ;;  %v6690_v0 = vpack.c.bf16 %v2161_v52, %v2154_v27  ;;  %v3203_v52 = vld [vmem:[%s8036_s8 + $0x78] sm:$0xff] }
 0x1b2   :  { %v2175_v17 = vand.u32 4294901760, %v7775_v50  ;;  %v2182_v63 = vand.u32 4294901760, %v7788_v62  ;;  %v2189_v20 = vand.u32 4294901760, %v7793_v26 }
 0x1b4   :  { %6581 = vmatpush3.bf16.msra.mxu0 %v6578_v39  ;;  %v2169_v39 = vsub.f32 %v7770_v46, %v2168_v61  ;;  %v2176_v42 = vsub.f32 %v7775_v50, %v2175_v17  ;;  %v2183_v12 = vsub.f32 %v7788_v62, %v2182_v63  ;;  %v2190_v41 = vsub.f32 %v7793_v26, %v2189_v20 }
 0x1b5   :  { %6583 = vmatprep.subr.bf16.mxu0 %v6582_v7  ;;  %v6698_v18 = vpack.c.bf16 %v2189_v20, %v2182_v63 }
 0x1b6   :  { %v2170_v58 = vand.u32 4294901760, %v2169_v39  ;;  %v2177_v29 = vand.u32 4294901760, %v2176_v42  ;;  %v2184_v37 = vand.u32 4294901760, %v2183_v12  ;;  %v2191_v59 = vand.u32 4294901760, %v2190_v41 }
 0x1b7   :  { %v6622_v39 = vpack.c.bf16 %v7735_v28, %v7733_v1  ;;  %v2664_v1 = vld [vmem:[%s8037_s6] sm:$0xff] }
 0x1b8   :  { %6585 = vmatpush3.bf16.msra.mxu0 %v6582_v7  ;;  %v6598_v7 = vpack.c.bf16 %v2177_v29, %v2170_v58  ;;  %v2667_v28 = vsel %vm1467_vm0, %v2664_v1, 0 }
 0x1b9   :  { %6587 = vmatprep.subr.bf16.mxu0 %v6586_v9 }
 0x1bc   :  { %6589 = vmatpush3.bf16.msra.mxu0 %v6586_v9  ;;  %v6602_v9 = vpack.c.bf16 %v2191_v59, %v2184_v37 }
 0x1bd   :  { %6591 = vmatprep.subr.bf16.mxu0 %v6590_v43 }
 0x1c0   :  { %6593 = vmatpush3.bf16.msra.mxu0 %v6590_v43  ;;  %v6614_v43 = vpack.c.bf16 %v7708_v36, %v7706_v30  ;;  %v8088_v30 = vand.u32 4294901760, %v7712_v60  ;;  %v6782_v36 = vpack.c.bf16 %v3201_v25, %v3200_v8  ;;  %v6694_v60 = vpack.c.bf16 %v2175_v17, %v2168_v61  ;;  %v4828_v17 = vld [vmem:[%s8038_s7] ss:$0 sm:$0xff] }
 0x1c1   :  { %6595 = vmatprep.subr.bf16.mxu0 %v6594_v19 }
 0x1c4   :  { %6597 = vmatpush3.bf16.msra.mxu0 %v6594_v19 }
 0x1c5   :  { %6599 = vmatprep.subr.bf16.mxu0 %v6598_v7 }
 0x1c8   :  { %6601 = vmatpush3.bf16.msra.mxu0 %v6598_v7  ;;  %v6626_v7 = vpack.c.bf16 %v7755_v32, %v7753_v34 }
 0x1c9   :  { %6603 = vmatprep.subr.bf16.mxu0 %v6602_v9 }
 0x1cc   :  { %6605 = vmatpush3.bf16.msra.mxu0 %v6602_v9 }
 0x1cd   :  { %6607 = vmatprep.subr.bf16.mxu0 %v6606_v5 }
 0x1cf   :  { %5813 = vmatmul.mubr.f32.vlgmr.msra.gmra.mrb[2].mxu0 %v7098_v57 }
 0x1d0   :  { %6609 = vmatpush3.bf16.msra.mxu0 %v6606_v5  ;;  %5847 = vmatprep.mubr.f32.mxu0 %v7071_v45 }
 0x1d1   :  { %6611 = vmatprep.subr.bf16.mxu0 %v6610_v22 }
 0x1d4   :  { %6613 = vmatpush3.bf16.msra.mxu0 %v6610_v22 }
 0x1d5   :  { %6615 = vmatprep.subr.bf16.mxu0 %v6614_v43 }
 0x1d8   :  { %6617 = vmatpush3.bf16.msra.mxu0 %v6614_v43  ;;  %v6630_v43 = vpack.c.bf16 %v7775_v50, %v7770_v46 }
 0x1d9   :  { %v5702_v21 = vpop.f32.mrb[2].mxu1  ;;  %6619 = vmatprep.subr.bf16.mxu0 %v6618_v2 }
 0x1da   :  { %v2673_v42 = vsel %vm1474_vm1, %v5702_v21, 0  ;;  %v1455_v19 = vpop.f32.mrb[3].mxu1 }
 0x1db   :  { %v2679_v58 = vand.u32 4294901760, %v2673_v42  ;;  %v2676_v45 = vand.u32 4294901760, %v1455_v19 }
 0x1dc   :  { %6621 = vmatpush3.bf16.msra.mxu0 %v6618_v2 }
 0x1dd   :  { %v2771_v29 = vsub.f32 %v2673_v42, %v2679_v58  ;;  %v7822_v12 = vpack.c.bf16 %v2679_v58, %v2676_v45  ;;  %v2764_v41 = vsub.f32 %v1455_v19, %v2676_v45  ;;  %6623 = vmatprep.subr.bf16.mxu0 %v6622_v39  ;;  %v6634_v19 = vpack.c.bf16 %v7793_v26, %v7788_v62 }
 0x1df   :  { %v2772_v37 = vand.u32 4294901760, %v2771_v29  ;;  %v2765_v59 = vand.u32 4294901760, %v2764_v41  ;;  %v7826_v9 = vpack.c.bf16 %v2771_v29, %v2764_v41 }
 0x1e0   :  { %6625 = vmatpush3.bf16.msra.mxu0 %v6622_v39  ;;  %v1548_v39 = vsub.f32 %v7584_v11, %v1547_v35  ;;  %v3188_v11 = vld [vmem:[%s8036_s8] sm:$0xff]  ;;  %v3190_v35 = vld [vmem:[%s8036_s8 + $0x10] sm:$0xff] }
 0x1e1   :  { %v2773_v5 = vsub.f32 %v2771_v29, %v2772_v37  ;;  %v2766_v22 = vsub.f32 %v2764_v41, %v2765_v59  ;;  %6627 = vmatprep.subr.bf16.mxu0 %v6626_v7  ;;  %v7830_v2 = vpack.c.bf16 %v2772_v37, %v2765_v59  ;;  %v3191_v29 = vld [vmem:[%s8036_s8 + $0x18] sm:$0xff]  ;;  %v3193_v37 = vld [vmem:[%s8036_s8 + $0x28] sm:$0xff] }
 0x1e2   :  { %v1549_v45 = vand.u32 4294901760, %v1548_v39  ;;  %v6762_v41 = vpack.c.bf16 %v3191_v29, %v3190_v35  ;;  %v6682_v39 = vpack.c.bf16 %v8088_v30, %v8087_v33 }
 0x1e3   :  { %v2767_v21 = vand.u32 4294901760, %v2766_v22  ;;  %v2774_v42 = vand.u32 4294901760, %v2773_v5  ;;  %v3194_v5 = vld [vmem:[%s8036_s8 + $0x30] sm:$0xff]  ;;  %v3195_v22 = vld [vmem:[%s8036_s8 + $0x38] sm:$0xff] }
 0x1e4   :  { %6629 = vmatpush3.bf16.msra.mxu0 %v6626_v7  ;;  %5707 = vmatprep.mubr.f32.mxu1 %v1549_v45  ;;  %v3192_v7 = vld [vmem:[%s8036_s8 + $0x20] sm:$0xff] }
 0x1e5   :  { %6631 = vmatprep.subr.bf16.mxu0 %v6630_v43  ;;  %v7834_v58 = vpack.c.bf16 %v2774_v42, %v2767_v21  ;;  %v6766_v59 = vpack.c.bf16 %v3193_v37, %v3192_v7  ;;  %v6770_v21 = vpack.c.bf16 %v3195_v22, %v3194_v5  ;;  %v3196_v42 = vld [vmem:[%s8036_s8 + $0x40] sm:$0xff] }
 0x1e8   :  { %6633 = vmatpush3.bf16.msra.mxu0 %v6630_v43  ;;  %v6670_v43 = vpack.c.bf16 %v2091_v24, %v2084_v15  ;;  %v3198_v15 = vld [vmem:[%s8036_s8 + $0x50] sm:$0xff]  ;;  %v3199_v24 = vld [vmem:[%s8036_s8 + $0x58] sm:$0xff] }
 0x1e9   :  { %6635 = vmatprep.subr.bf16.mxu0 %v6634_v19 }
 0x1ec   :  { %6637 = vmatpush3.bf16.msra.mxu0 %v6634_v19  ;;  %v3197_v19 = vld [vmem:[%s8036_s8 + $0x48] sm:$0xff] }
 0x1ed   :  { %6639 = vmatprep.subr.bf16.mxu0 %v7603_v56  ;;  %v6774_v47 = vpack.c.bf16 %v3197_v19, %v3196_v42  ;;  %v3785_v42 = vld [vmem:[%s8040_s11] sm:$0x3] }
 0x1ee   :  { %v3802_v19 = vsel %vm3800_vm3, %v3785_v42, 0 }
 0x1ef   :  { %5848 = vmatmul.mubr.f32.vlgmr.msra.gmra.mrb[2].mxu0 %v7119_v4  ;;  %v1558_v4 = vsub.f32 %v7587_v23, %v1557_v51  ;;  %v3189_v23 = vld [vmem:[%s8036_s8 + $0x8] sm:$0xff] }
 0x1f0   :  { %6641 = vmatpush3.bf16.msra.mxu0 %v7603_v56  ;;  %5882 = vmatprep.mubr.f32.mxu0 %v7084_v49  ;;  %v6758_v51 = vpack.c.bf16 %v3189_v23, %v3188_v11 }
 0x1f1   :  { %6643 = vmatprep.subr.bf16.mxu0 %v7619_v3  ;;  %v1559_v49 = vand.u32 4294901760, %v1558_v4 }
 0x1f2   :  { %6759 = vmatprep.subr.bf16.mxu1 %v6758_v51 }
 0x1f3   :  { %5708 = vmatmul.mubr.f32.vlgmr.msra.gmra.mrb[4].mxu1 %v1559_v49 }
 0x1f4   :  { %6645 = vmatpush3.bf16.msra.mxu0 %v7619_v3  ;;  %6761 = vmatpush3.bf16.msra.mxu1 %v6758_v51 }
 0x1f5   :  { %6647 = vmatprep.subr.bf16.mxu0 %v7630_v48  ;;  %6763 = vmatprep.subr.bf16.mxu1 %v6762_v41 }
 0x1f8   :  { %6649 = vmatpush3.bf16.msra.mxu0 %v7630_v48  ;;  %6765 = vmatpush3.bf16.msra.mxu1 %v6762_v41 }
 0x1f9   :  { %6651 = vmatprep.subr.bf16.mxu0 %v7640_v55  ;;  %6767 = vmatprep.subr.bf16.mxu1 %v6766_v59 }
 0x1fc   :  { %6653 = vmatpush3.bf16.msra.mxu0 %v7640_v55  ;;  %6769 = vmatpush3.bf16.msra.mxu1 %v6766_v59 }
 0x1fd   :  { %6655 = vmatprep.subr.bf16.mxu0 %v7664_v40  ;;  %6771 = vmatprep.subr.bf16.mxu1 %v6770_v21 }
 0x200   :  { %6657 = vmatpush3.bf16.msra.mxu0 %v7664_v40  ;;  %6773 = vmatpush3.bf16.msra.mxu1 %v6770_v21 }
 0x201   :  { %6659 = vmatprep.subr.bf16.mxu0 %v7672_v16  ;;  %6775 = vmatprep.subr.bf16.mxu1 %v6774_v47 }
 0x204   :  { %6661 = vmatpush3.bf16.msra.mxu0 %v7672_v16  ;;  %6777 = vmatpush3.bf16.msra.mxu1 %v6774_v47 }
 0x205   :  { %6663 = vmatprep.subr.bf16.mxu0 %v7692_v54 }
 0x208   :  { %6665 = vmatpush3.bf16.msra.mxu0 %v7692_v54 }
 0x209   :  { %6667 = vmatprep.subr.bf16.mxu0 %v7719_v14 }
 0x20c   :  { %6669 = vmatpush3.bf16.msra.mxu0 %v7719_v14 }
 0x20d   :  { %6671 = vmatprep.subr.bf16.mxu0 %v6670_v43 }
 0x20f   :  { %5883 = vmatmul.mubr.f32.vlgmr.msra.gmra.mrb[2].mxu0 %v7140_v13  ;;  %v6778_v13 = vpack.c.bf16 %v3199_v24, %v3198_v15 }
 0x210   :  { %6673 = vmatpush3.bf16.msra.mxu0 %v6670_v43  ;;  %5917 = vmatprep.mubr.f32.mxu0 %v7059_v38 }
 0x211   :  { %6675 = vmatprep.subr.bf16.mxu0 %v6674_v6  ;;  %6779 = vmatprep.subr.bf16.mxu1 %v6778_v13 }
 0x212   :  { %6781 = vmatpush3.bf16.msra.mxu1 %v6778_v13  ;;  %v4829_v13 = vld [vmem:[%s8041_s10] ss:$0 sm:$0xff] }
 0x213   :  { %6783 = vmatprep.subr.bf16.mxu1 %v6782_v36 }
 0x214   :  { %6677 = vmatpush3.bf16.msra.mxu0 %v6674_v6  ;;  %v7996_v6 = vand.u32 4294901760, %v3802_v19 }
 0x215   :  { %6679 = vmatprep.subr.bf16.mxu0 %v6678_v44 }
 0x216   :  { %6785 = vmatpush3.bf16.msra.mxu1 %v6782_v36  ;;  %v3892_v47 = vsub.f32 %v3802_v19, %v7996_v6 }
 0x218   :  { %6681 = vmatpush3.bf16.msra.mxu0 %v6678_v44  ;;  %v3893_v15 = vand.u32 4294901760, %v3892_v47 }
 0x219   :  { %6683 = vmatprep.subr.bf16.mxu0 %v6682_v39 }
 0x21a   :  { %v3894_v24 = vsub.f32 %v3892_v47, %v3893_v15 }
 0x21c   :  { %6685 = vmatpush3.bf16.msra.mxu0 %v6682_v39  ;;  %v3895_v44 = vand.u32 4294901760, %v3894_v24 }
 0x21d   :  { %6687 = vmatprep.subr.bf16.mxu0 %v6686_v31 }
 0x220   :  { %6689 = vmatpush3.bf16.msra.mxu0 %v6686_v31 }
 0x221   :  { %6691 = vmatprep.subr.bf16.mxu0 %v6690_v0 }
 0x224   :  { %6693 = vmatpush3.bf16.msra.mxu0 %v6690_v0 }
 0x225   :  { %6695 = vmatprep.subr.bf16.mxu0 %v6694_v60 }
 0x228   :  { %6697 = vmatpush3.bf16.msra.mxu0 %v6694_v60 }
 0x229   :  { %6699 = vmatprep.subr.bf16.mxu0 %v6698_v18 }
 0x22c   :  { %6701 = vmatpush3.bf16.msra.mxu0 %v6698_v18 }
 0x22d   :  { %6703 = vmatprep.subr.bf16.mxu0 %v7603_v56 }
 0x22f   :  { %5918 = vmatmul.mubr.f32.vlgmr.msra.gmra.mrb[2].mxu0 %v7098_v57 }
 0x230   :  { %6705 = vmatpush3.bf16.msra.mxu0 %v7603_v56  ;;  %5952 = vmatprep.mubr.f32.mxu0 %v7059_v38  ;;  %v2742_v56 = vand.u32 4294901760, %v2667_v28  ;;  %v2665_v38 = vld [vmem:[%s8037_s6 + $0x8] sm:$0xf] }
 0x231   :  { %6707 = vmatprep.subr.bf16.mxu0 %v7619_v3  ;;  %v2670_v53 = vsel %vm1467_vm0, %v2665_v38, 0 }
 0x234   :  { %6709 = vmatpush3.bf16.msra.mxu0 %v7619_v3  ;;  %v2743_v3 = vsub.f32 %v2667_v28, %v2742_v56 }
 0x235   :  { %6711 = vmatprep.subr.bf16.mxu0 %v7630_v48 }
 0x236   :  { %v2744_v10 = vand.u32 4294901760, %v2743_v3 }
 0x238   :  { %6713 = vmatpush3.bf16.msra.mxu0 %v7630_v48  ;;  %v2752_v48 = vand.u32 4294901760, %v2670_v53  ;;  %v2745_v34 = vsub.f32 %v2743_v3, %v2744_v10 }
 0x239   :  { %6715 = vmatprep.subr.bf16.mxu0 %v7640_v55 }
 0x23c   :  { %6717 = vmatpush3.bf16.msra.mxu0 %v7640_v55  ;;  %v2753_v55 = vsub.f32 %v2670_v53, %v2752_v48 }
 0x23d   :  { %6719 = vmatprep.subr.bf16.mxu0 %v7664_v40 }
 0x23e   :  { %v2754_v32 = vand.u32 4294901760, %v2753_v55 }
 0x240   :  { %6721 = vmatpush3.bf16.msra.mxu0 %v7664_v40  ;;  %v2746_v40 = vand.u32 4294901760, %v2745_v34  ;;  %v2755_v27 = vsub.f32 %v2753_v55, %v2754_v32  ;;  %v4310_v34 = vld [vmem:[%s8042_s1 + $0x8] sm:$0xff] }
 0x241   :  { %6723 = vmatprep.subr.bf16.mxu0 %v7672_v16 }
 0x244   :  { %6725 = vmatpush3.bf16.msra.mxu0 %v7672_v16  ;;  %v2756_v16 = vand.u32 4294901760, %v2755_v27  ;;  %v4322_v27 = vand.u32 4294901760, %v4310_v34 }
 0x245   :  { %6727 = vmatprep.subr.bf16.mxu0 %v7692_v54 }
 0x248   :  { %6729 = vmatpush3.bf16.msra.mxu0 %v7692_v54 }
 0x249   :  { %6731 = vmatprep.subr.bf16.mxu0 %v7719_v14 }
 0x24c   :  { %6733 = vmatpush3.bf16.msra.mxu0 %v7719_v14  ;;  %v3202_v14 = vld [vmem:[%s8036_s8 + $0x70] sm:$0xff] }
 0x24d   :  { %6735 = vmatprep.subr.bf16.mxu0 %v7822_v12  ;;  %v6786_v46 = vpack.c.bf16 %v3203_v52, %v3202_v14 }
 0x24f   :  { %5953 = vmatmul.mubr.f32.vlgmr.msra.gmra.mrb[2].mxu0 %v7098_v57  ;;  %6787 = vmatprep.subr.bf16.mxu1 %v6786_v46 }
 0x250   :  { %6737 = vmatpush3.bf16.msra.mxu0 %v7822_v12  ;;  %5959 = vmatprep.mubr.f32.mxu0 %v2746_v40 }
 0x251   :  { %6739 = vmatprep.subr.bf16.mxu0 %v7834_v58  ;;  %6789 = vmatpush3.bf16.msra.mxu1 %v6786_v46  ;;  %v4414_v46 = vsub.f32 %v4310_v34, %v4322_v27 }
 0x257   :  { %5960 = vmatmul.mubr.f32.vlgmr.msra.gmra.mrb[2].mxu0 %v2756_v16  ;;  %v4308_v16 = vld [vmem:[%s8043_s13 + $0x8] sm:$0xf] }
 0x258   :  { %6741 = vmatpush3.bf16.msra.mxu0 %v7834_v58  ;;  %5966 = vmatprep.mubr.f32.mxu0 %v2742_v56 }
 0x259   :  { %6743 = vmatprep.subr.bf16.mxu0 %v7826_v9 }
 0x25f   :  { %5967 = vmatmul.mubr.f32.vlgmr.msra.gmra.mrb[2].mxu0 %v2752_v48 }
 0x260   :  { %6745 = vmatpush3.bf16.msra.mxu0 %v7826_v9  ;;  %5973 = vmatprep.mubr.f32.mxu0 %v2743_v3 }
 0x261   :  { %6747 = vmatprep.subr.bf16.mxu0 %v7822_v12 }
 0x267   :  { %5974 = vmatmul.mubr.f32.vlgmr.msra.gmra.mrb[2].mxu0 %v2753_v55  ;;  %v4309_v55 = vld [vmem:[%s8042_s1] sm:$0xff] }
 0x268   :  { %6749 = vmatpush3.bf16.msra.mxu0 %v7822_v12  ;;  %5980 = vmatprep.mubr.f32.mxu0 %v2744_v10  ;;  %v4319_v40 = vand.u32 4294901760, %v4309_v55 }
 0x269   :  { %6751 = vmatprep.subr.bf16.mxu0 %v7830_v2 }
 0x26a   :  { %v4407_v52 = vsub.f32 %v4309_v55, %v4319_v40 }
 0x26f   :  { %5981 = vmatmul.mubr.f32.vlgmr.msra.gmra.mrb[2].mxu0 %v2754_v32  ;;  %v4307_v32 = vld [vmem:[%s8043_s13] sm:$0xff] }
 0x270   :  { %6753 = vmatpush3.bf16.msra.mxu0 %v7830_v2  ;;  %5987 = vmatprep.mubr.f32.mxu0 %v2742_v56 }
 0x271   :  { %6755 = vmatprep.subr.bf16.mxu0 %v7822_v12 }
 0x277   :  { %5988 = vmatmul.mubr.f32.vlgmr.msra.gmra.mrb[2].mxu0 %v2752_v48 }
 0x278   :  { %6757 = vmatpush3.bf16.msra.mxu0 %v7822_v12  ;;  %5994 = vmatprep.mubr.f32.mxu0 %v2742_v56  ;;  %v3279_v12 = vld [vmem:[%s8039_s9] sm:$0xff] }
 0x279   :  { %v3295_v9 = vand.u32 4294901760, %v3279_v12 }
 0x27b   :  { %6032 = vmatprep.subr.mxu1 %v3295_v9  ;;  %v3382_v2 = vsub.f32 %v3279_v12, %v3295_v9 }
 0x27d   :  { %v3383_v58 = vand.u32 4294901760, %v3382_v2 }
 0x27f   :  { %5995 = vmatmul.mubr.f32.vlgmr.msra.gmra.mrb[2].mxu0 %v2752_v48  ;;  %v3384_v4 = vsub.f32 %v3382_v2, %v3383_v58 }
 0x281   :  { %v3385_v45 = vand.u32 4294901760, %v3384_v4 }
 0x2c6   :  { %v5709_v57 = vpop.f32.mrb[4].mxu1 }
 0x2c7   :  { %v1551_v54 = vpop.f32.mrb[5].mxu1 }
 0x352   :  { %v5996_v50 = vpop.f32.mrb[2].mxu0 }
 0x353   :  { %v6816_v61 = vadd.f32 %v5996_v50, %v5709_v57  ;;  %v3167_v62 = vpop.f32.mrb[3].mxu0  ;;  %v4313_v57 = vsel %vm4311_vm5, %v4307_v32, 0 }
 0x354   :  { %v6817_v26 = vadd.f32 %v3167_v62, %v1551_v54  ;;  %v4316_v54 = vsel %vm4311_vm5, %v4308_v16, 0  ;;  %v4385_v14 = vand.u32 4294901760, %v4313_v57  ;;  %v4415_v62 = vand.u32 4294901760, %v4414_v46 }
 0x355   :  { %v7986_v20 = vadd.f32 %v6816_v61, %v4828_v17  ;;  %v4395_v50 = vand.u32 4294901760, %v4316_v54 }
 0x356   :  { %v7984_v63 = vadd.f32 %v6817_v26, %v4828_v17  ;;  %v4386_v61 = vsub.f32 %v4313_v57, %v4385_v14  ;;  %v4408_v17 = vand.u32 4294901760, %v4407_v52 }
 0x357   :  { %v4396_v26 = vsub.f32 %v4316_v54, %v4395_v50 }
 0x358   :  { %6029 = vmatprep.mubr.f32.mxu1 %v7984_v63  ;;  %v4387_v12 = vand.u32 4294901760, %v4386_v61 }
 0x359   :  { %6030 = vmatmul.mubr.f32.vlgmr.msra.gmra.mrb[6].mxu1 %v7986_v20  ;;  %v4397_v4 = vand.u32 4294901760, %v4396_v26 }
 0x35a   :  { %6033 = vmatpush3.msra.mxu1 %v3295_v9 }
 0x35b   :  { %6037 = vmatprep.subr.mxu1 %v3385_v45 }
 0x42c   :  { %v6031_v49 = vpop.f32.mrb[6].mxu1 }
 0x42d   :  { %v3292_v11 = vsel %vm3287_vm2, %v6031_v49, 0  ;;  %v3270_v23 = vpop.f32.mrb[7].mxu1 }
 0x42e   :  { %v3370_v35 = vand.u32 4294901760, %v3292_v11  ;;  %v3289_v51 = vsel %vm3287_vm2, %v3270_v23, 0  ;;  %v4398_v23 = vsub.f32 %v4396_v26, %v4397_v4 }
 0x42f   :  { %v3360_v29 = vand.u32 4294901760, %v3289_v51 }
 0x430   :  { %v3371_v41 = vsub.f32 %v3292_v11, %v3370_v35 }
 0x431   :  { %v3361_v7 = vsub.f32 %v3289_v51, %v3360_v29 }
 0x432   :  { %v3372_v37 = vand.u32 4294901760, %v3371_v41 }
 0x433   :  { %v3362_v59 = vand.u32 4294901760, %v3361_v7 }
 0x434   :  { %v3373_v5 = vsub.f32 %v3371_v41, %v3372_v37 }
 0x435   :  { %v3363_v22 = vsub.f32 %v3361_v7, %v3362_v59 }
 0x436   :  { %v3374_v21 = vand.u32 4294901760, %v3373_v5  ;;  %v4830_v5 = vld [vmem:[%s8044_s12] ss:$0 sm:$0xff] }
 0x437   :  { %v3364_v43 = vand.u32 4294901760, %v3363_v22 }
 0x439   :  { %6034 = vmatprep.mubr.f32.mxu1 %v3364_v43 }
 0x43a   :  { %6035 = vmatmul.mubr.f32.vlgmr.msra.gmra.mrb[8].mxu1 %v3374_v21 }
 0x43b   :  { %6038 = vmatpush3.msra.mxu1 %v3385_v45  ;;  %6039 = vmatprep.mubr.f32.mxu1 %v3360_v29  ;;  %v4388_v45 = vsub.f32 %v4386_v61, %v4387_v12 }
 0x43c   :  { %6042 = vmatprep.subr.mxu1 %v3382_v2 }
 0x442   :  { %6040 = vmatmul.mubr.f32.vlgmr.msra.gmra.mrb[8].mxu1 %v3370_v35 }
 0x443   :  { %6043 = vmatpush3.msra.mxu1 %v3382_v2  ;;  %6044 = vmatprep.mubr.f32.mxu1 %v3361_v7  ;;  %v4409_v2 = vsub.f32 %v4407_v52, %v4408_v17  ;;  %v6806_v7 = vpack.c.bf16 %v4415_v62, %v4408_v17 }
 0x444   :  { %6047 = vmatprep.subr.mxu1 %v3295_v9 }
 0x445   :  { %v4410_v49 = vand.u32 4294901760, %v4409_v2 }
 0x44a   :  { %6045 = vmatmul.mubr.f32.vlgmr.msra.gmra.mrb[8].mxu1 %v3371_v41  ;;  %v6798_v41 = vpack.c.bf16 %v4414_v46, %v4407_v52 }
 0x44b   :  { %6048 = vmatpush3.msra.mxu1 %v3295_v9  ;;  %6049 = vmatprep.mubr.f32.mxu1 %v3362_v59 }
 0x44c   :  { %6052 = vmatprep.subr.mxu1 %v3383_v58 }
 0x452   :  { %6050 = vmatmul.mubr.f32.vlgmr.msra.gmra.mrb[8].mxu1 %v3372_v37 }
 0x453   :  { %6053 = vmatpush3.msra.mxu1 %v3383_v58  ;;  %6054 = vmatprep.mubr.f32.mxu1 %v3360_v29  ;;  %v4416_v58 = vsub.f32 %v4414_v46, %v4415_v62 }
 0x454   :  { %6057 = vmatprep.subr.mxu1 %v3295_v9 }
 0x455   :  { %v4417_v11 = vand.u32 4294901760, %v4416_v58 }
 0x457   :  { %v6794_v51 = vpack.c.bf16 %v4417_v11, %v4410_v49 }
 0x45a   :  { %6055 = vmatmul.mubr.f32.vlgmr.msra.gmra.mrb[8].mxu1 %v3370_v35 }
 0x45b   :  { %6058 = vmatpush3.msra.mxu1 %v3295_v9  ;;  %6059 = vmatprep.mubr.f32.mxu1 %v3360_v29  ;;  %v6790_v9 = vpack.c.bf16 %v4322_v27, %v4319_v40  ;;  %v4399_v29 = vand.u32 4294901760, %v4398_v23 }
 0x45c   :  { %6062 = vmatprep.subr.mxu1 %v7996_v6 }
 0x462   :  { %6060 = vmatmul.mubr.f32.vlgmr.msra.gmra.mrb[8].mxu1 %v3370_v35  ;;  %v4389_v35 = vand.u32 4294901760, %v4388_v45 }
 0x463   :  { %6063 = vmatpush3.msra.mxu1 %v7996_v6 }
 0x464   :  { %6067 = vmatprep.subr.mxu1 %v3895_v44 }
 0x535   :  { %v6061_v8 = vpop.f32.mrb[8].mxu1 }
 0x536   :  { %v6818_v25 = vadd.f32 %v6061_v8, %v4829_v13  ;;  %v3773_v33 = vpop.f32.mrb[9].mxu1 }
 0x537   :  { %v6819_v30 = vadd.f32 %v4829_v13, %v3773_v33 }
 0x538   :  { %v3784_v39 = vmax.f32 %v6818_v25, 0.0 }
 0x539   :  { %v3783_v36 = vmax.f32 %v6819_v30, 0.0 }
 0x53a   :  { %v3798_v31 = vsel %vm3793_vm4, %v3784_v39, 0 }
 0x53b   :  { %v3880_v0 = vand.u32 4294901760, %v3798_v31  ;;  %v3795_v60 = vsel %vm3793_vm4, %v3783_v36, 0 }
 0x53c   :  { %v3870_v18 = vand.u32 4294901760, %v3795_v60 }
 0x53d   :  { %v3881_v1 = vsub.f32 %v3798_v31, %v3880_v0 }
 0x53e   :  { %v3871_v28 = vsub.f32 %v3795_v60, %v3870_v18 }
 0x53f   :  { %v3882_v56 = vand.u32 4294901760, %v3881_v1 }
 0x540   :  { %v3872_v38 = vand.u32 4294901760, %v3871_v28 }
 0x541   :  { %v3883_v3 = vsub.f32 %v3881_v1, %v3882_v56 }
 0x542   :  { %v3873_v53 = vsub.f32 %v3871_v28, %v3872_v38 }
 0x543   :  { %v3884_v10 = vand.u32 4294901760, %v3883_v3 }
 0x544   :  { %v3874_v48 = vand.u32 4294901760, %v3873_v53 }
 0x546   :  { %6064 = vmatprep.mubr.f32.mxu1 %v3874_v48 }
 0x547   :  { %6065 = vmatmul.mubr.f32.vlgmr.msra.gmra.mrb[10].mxu1 %v3884_v10 }
 0x548   :  { %6068 = vmatpush3.msra.mxu1 %v3895_v44  ;;  %6069 = vmatprep.mubr.f32.mxu1 %v3870_v18 }
 0x549   :  { %6072 = vmatprep.subr.mxu1 %v3892_v47 }
 0x54f   :  { %6070 = vmatmul.mubr.f32.vlgmr.msra.gmra.mrb[10].mxu1 %v3880_v0 }
 0x550   :  { %6073 = vmatpush3.msra.mxu1 %v3892_v47  ;;  %6074 = vmatprep.mubr.f32.mxu1 %v3871_v28 }
 0x551   :  { %6077 = vmatprep.subr.mxu1 %v7996_v6 }
 0x557   :  { %6075 = vmatmul.mubr.f32.vlgmr.msra.gmra.mrb[10].mxu1 %v3881_v1 }
 0x558   :  { %6078 = vmatpush3.msra.mxu1 %v7996_v6  ;;  %6079 = vmatprep.mubr.f32.mxu1 %v3872_v38 }
 0x559   :  { %6082 = vmatprep.subr.mxu1 %v3893_v15 }
 0x55f   :  { %6080 = vmatmul.mubr.f32.vlgmr.msra.gmra.mrb[10].mxu1 %v3882_v56 }
 0x560   :  { %6083 = vmatpush3.msra.mxu1 %v3893_v15  ;;  %6084 = vmatprep.mubr.f32.mxu1 %v3870_v18 }
 0x561   :  { %6087 = vmatprep.subr.mxu1 %v7996_v6 }
 0x567   :  { %6085 = vmatmul.mubr.f32.vlgmr.msra.gmra.mrb[10].mxu1 %v3880_v0 }
 0x568   :  { %6088 = vmatpush3.msra.mxu1 %v7996_v6  ;;  %6089 = vmatprep.mubr.f32.mxu1 %v3870_v18 }
 0x569   :  { %6791 = vmatprep.subr.bf16.mxu1 %v6790_v9 }
 0x56f   :  { %6090 = vmatmul.mubr.f32.vlgmr.msra.gmra.mrb[10].mxu1 %v3880_v0 }
 0x570   :  { %6793 = vmatpush3.bf16.msra.mxu1 %v6790_v9  ;;  %6096 = vmatprep.mubr.f32.mxu1 %v4389_v35 }
 0x571   :  { %6795 = vmatprep.subr.bf16.mxu1 %v6794_v51 }
 0x573   :  { %6097 = vmatmul.mubr.f32.vlgmr.msra.gmra.mrb[12].mxu1 %v4399_v29 }
 0x574   :  { %6797 = vmatpush3.bf16.msra.mxu1 %v6794_v51  ;;  %6103 = vmatprep.mubr.f32.mxu1 %v4385_v14 }
 0x575   :  { %6799 = vmatprep.subr.bf16.mxu1 %v6798_v41 }
 0x57b   :  { %6104 = vmatmul.mubr.f32.vlgmr.msra.gmra.mrb[12].mxu1 %v4395_v50 }
 0x57c   :  { %6801 = vmatpush3.bf16.msra.mxu1 %v6798_v41  ;;  %6110 = vmatprep.mubr.f32.mxu1 %v4386_v61 }
 0x57d   :  { %6803 = vmatprep.subr.bf16.mxu1 %v6790_v9 }
 0x583   :  { %6111 = vmatmul.mubr.f32.vlgmr.msra.gmra.mrb[12].mxu1 %v4396_v26 }
 0x584   :  { %6805 = vmatpush3.bf16.msra.mxu1 %v6790_v9  ;;  %6117 = vmatprep.mubr.f32.mxu1 %v4387_v12 }
 0x585   :  { %6807 = vmatprep.subr.bf16.mxu1 %v6806_v7 }
 0x58b   :  { %6118 = vmatmul.mubr.f32.vlgmr.msra.gmra.mrb[12].mxu1 %v4397_v4 }
 0x58c   :  { %6809 = vmatpush3.bf16.msra.mxu1 %v6806_v7  ;;  %6124 = vmatprep.mubr.f32.mxu1 %v4385_v14 }
 0x58d   :  { %6811 = vmatprep.subr.bf16.mxu1 %v6790_v9 }
 0x593   :  { %6125 = vmatmul.mubr.f32.vlgmr.msra.gmra.mrb[12].mxu1 %v4395_v50 }
 0x594   :  { %6813 = vmatpush3.bf16.msra.mxu1 %v6790_v9  ;;  %6131 = vmatprep.mubr.f32.mxu1 %v4385_v14 }
 0x59b   :  { %6132 = vmatmul.mubr.f32.vlgmr.msra.gmra.mrb[12].mxu1 %v4395_v50 }
 0x642   :  { %v6091_v37 = vpop.f32.mrb[10].mxu1 }
 0x643   :  { %v4283_v59 = vpop.f32.mrb[11].mxu1  ;;  %v6820_v22 = vadd.f32 %v6091_v37, %v4830_v5 }
 0x644   :  { %v6821_v43 = vadd.f32 %v4830_v5, %v4283_v59 }
 0x645   :  { %v4832_v21 = vmul.f32 -1.442695, %v6820_v22 }
 0x646   :  { %v4831_v42 = vmul.f32 -1.442695, %v6821_v43 }
 0x647   :  { %6902 = vpow2.f32 %v4832_v21 }
 0x648   :  { %6904 = vpow2.f32 %v4831_v42 }
 0x651   :  { %v6903_v19 = vpop.eup %6902 }
 0x652   :  { %v6905_v6 = vpop.eup %6904  ;;  %v4300_v47 = vadd.f32 1.0, %v6903_v19 }
 0x653   :  { %v4299_v15 = vadd.f32 1.0, %v6905_v6 }
 0x654   :  { %6906 = vrcp.f32 %v4300_v47 }
 0x655   :  { %6908 = vrcp.f32 %v4299_v15 }
 0x65e   :  { %v6907_v24 = vpop.eup %6906 }
 0x65f   :  { %v6909_v44 = vpop.eup %6908  ;;  %v4306_v13 = vmul.f32 %v6907_v24, %v7986_v20 }
 0x660   :  { %v4305_v25 = vmul.f32 %v6909_v44, %v7984_v63 }
 0x66e   :  { %v6133_v8 = vpop.f32.mrb[12].mxu1 }
 0x66f   :  { %v4821_v33 = vadd.f32 %v6133_v8, %v4306_v13  ;;  %v4810_v30 = vpop.f32.mrb[13].mxu1 }
 0x670   :  { %v4820_v39 = vadd.f32 %v4810_v30, %v4305_v25 }
 0x671   :  { %4823 = vst [vmem:[%s8045_s14 + $0x8] sm:$0xf] %v4821_v33 }
 0x672   :  { %4822 = vst [vmem:[%s8045_s14] sm:$0xff] %v4820_v39 }

</bundles_post_ra>
